<compile_context>
chip_gen: v7x
topology: tpu7x:2x2x1
jax: 0.10.0
libtpu: 0.0.40
codegen_flags: <defaults>
</compile_context>

<pallas_src>
import functools

import jax
import jax.numpy as jnp
from jax.experimental import pallas as pl
from jax.experimental.pallas import tpu as pltpu

_SQRT_HALF = 0.7071067811865476
_BN_EPS = 1e-5


def _erf(x):
    # Abramowitz & Stegun 7.1.26 polynomial, max abs error ~1.5e-7 (f32-level exact).
    # TODO(synk): lax.erf has no guaranteed Mosaic lowering; polynomial stand-in for erf-GELU.
    ax = jnp.abs(x)
    t = 1.0 / (1.0 + 0.3275911 * ax)
    poly = t * (0.254829592 + t * (-0.284496736 + t * (1.421413741
             + t * (-1.453152027 + t * 1.061405429))))
    y = 1.0 - poly * jnp.exp(-ax * ax)
    return jnp.where(x >= 0.0, y, -y)


def _gelu(x):
    # PyTorch nn.GELU() / F.gelu default = exact (erf) GELU.
    return 0.5 * x * (1.0 + _erf(x * _SQRT_HALF))


def _diffusion_block_kernel(x_ref, tT_ref,
                            w1_ref, b1_ref, g1_ref, be1_ref,
                            w2_ref, b2_ref, g2_ref, be2_ref,
                            wt_ref, bt_ref, wr_ref, br_ref,
                            out_ref, *, seq_len, seq_pad):
    f32 = jnp.float32
    _, NLp = out_ref.shape
    L, Lp = seq_len, seq_pad
    N = NLp // Lp
    cnt = float(N * L)                   # BN count = real elements only
    cdt = x_ref.dtype                    # matmul operand dtype (bf16 or f32)

    # Per-segment position masks.  `valid` marks real (unpadded) lanes; not_first/not_last
    # implement the Conv1d zero padding at segment boundaries (also covers the Lp==L case
    # where the shift would otherwise pull data across batch segments).
    pos = jax.lax.broadcasted_iota(jnp.int32, (1, NLp), 1) % Lp
    valid = pos < L
    not_first = pos != 0
    not_last = pos != (L - 1)

    def shifted(v):
        # prev[:, l] = v[:, l-1] (0 at l==0), nxt[:, l] = v[:, l+1] (0 at l==L-1).
        zcol = jnp.zeros((v.shape[0], 1), v.dtype)
        zero = jnp.zeros((), v.dtype)
        prev = jnp.where(not_first, jnp.concatenate([zcol, v[:, :-1]], axis=1), zero)
        nxt = jnp.where(not_last, jnp.concatenate([v[:, 1:], zcol], axis=1), zero)
        return prev, nxt

    def conv3(w_ref, b, v):
        # k=3 conv as three accumulated matmuls (no 3C x NL im2col materialization).
        prev, nxt = shifted(v)
        acc = jnp.dot(w_ref[1], v, preferred_element_type=f32)
        acc = acc + jnp.dot(w_ref[0], prev, preferred_element_type=f32)
        acc = acc + jnp.dot(w_ref[2], nxt, preferred_element_type=f32)
        return acc + b

    def bn_scale_shift(h, g, be):
        # Training-mode BN folded to one scale/shift; pad lanes masked out of the stats;
        # centered two-pass variance (avoids E[x^2]-E[x]^2 cancellation).
        hm = jnp.where(valid, h, 0.0)
        mean = jnp.sum(hm, axis=1, keepdims=True) / cnt
        d = jnp.where(valid, h - mean, 0.0)
        var = jnp.sum(d * d, axis=1, keepdims=True) / cnt
        scale = jax.lax.rsqrt(var + _BN_EPS) * g
        shift = be - mean * scale
        return scale, shift

    x = x_ref[...]                                            # (Cin_p, NLp), compute dtype

    # ---- conv1 -> BN1 -> GELU -------------------------------------------------------------
    h1 = conv3(w1_ref, b1_ref[...], x)
    s1, o1 = bn_scale_shift(h1, g1_ref[...], be1_ref[...])
    hact = _gelu(h1 * s1 + o1)                                # (Cout_p, NLp) f32

    # ---- time MLP: Linear + GELU on (Cout_p, N), then per-segment lane-broadcast add ------
    # (static unroll over the python-int batch size; replaces the old K=N one-hot matmul)
    t_act = _gelu(jnp.dot(wt_ref[...], tT_ref[...], preferred_element_type=f32)
                  + bt_ref[...])                              # (Cout_p, N) f32
    parts = [hact[:, n * Lp:(n + 1) * Lp] + t_act[:, n:n + 1] for n in range(N)]
    h = jnp.concatenate(parts, axis=1) if N > 1 else parts[0]

    # ---- zero pad lanes (doubles as conv2's zero padding), conv2 -> BN2 -------------------
    h_in = jnp.where(valid, h, 0.0).astype(cdt)
    h2 = conv3(w2_ref, b2_ref[...], h_in)
    s2, o2 = bn_scale_shift(h2, g2_ref[...], be2_ref[...])

    # ---- GELU + 1x1 residual conv, lane-dense (unmasked) store -----------------------------
    res = jnp.dot(wr_ref[...], x, preferred_element_type=f32) + br_ref[...]
    out_ref[...] = (_gelu(h2 * s2 + o2) + res).astype(out_ref.dtype)


def init_params(key, in_channels, out_channels, time_emb_dim):
    """Deterministic, PyTorch-like uniform(-1/sqrt(fan_in), 1/sqrt(fan_in)) init."""
    ks = jax.random.split(key, 8)

    def uni(k, shape, fan_in):
        b = 1.0 / jnp.sqrt(jnp.float32(fan_in))
        return jax.random.uniform(k, shape, jnp.float32, -b, b)

    p = {}
    p["w1"] = uni(ks[0], (out_channels, in_channels, 3), in_channels * 3)
    p["b1"] = uni(ks[1], (out_channels,), in_channels * 3)
    p["g1"] = jnp.ones((out_channels,), jnp.float32)
    p["beta1"] = jnp.zeros((out_channels,), jnp.float32)
    p["w2"] = uni(ks[2], (out_channels, out_channels, 3), out_channels * 3)
    p["b2"] = uni(ks[3], (out_channels,), out_channels * 3)
    p["g2"] = jnp.ones((out_channels,), jnp.float32)
    p["beta2"] = jnp.zeros((out_channels,), jnp.float32)
    p["wt"] = uni(ks[4], (out_channels, time_emb_dim), time_emb_dim)   # Linear: (out, in)
    p["bt"] = uni(ks[5], (out_channels,), time_emb_dim)
    p["wr"] = uni(ks[6], (out_channels, in_channels), in_channels)     # 1x1 residual conv
    p["br"] = uni(ks[7], (out_channels,), in_channels)
    return p


def _round_up(v, m):
    return ((v + m - 1) // m) * m


def diffusion_block(x, t_emb, params, *, matmul_dtype=jnp.bfloat16):
    N, Cin, L = x.shape
    Cout = params["w1"].shape[0]
    T = params["wt"].shape[1]
    f32 = jnp.float32
    cdt = matmul_dtype

    # Channel dims padded to a multiple of 16 (tile-aligned sublanes for f32 and bf16);
    # per-segment length padded to a multiple of 128 (lane-dense, unmasked stores).
    Cin_p, Cout_p = _round_up(Cin, 16), _round_up(Cout, 16)
    Lp = _round_up(L, 128)
    NLp = N * Lp

    # Layout glue (plain XLA): NCL -> (Cin_p, N*Lp) lane-dense slab; pads are exact zeros.
    xf = jnp.transpose(x.astype(f32), (1, 0, 2))                        # (Cin, N, L)
    xf = jnp.pad(xf, ((0, Cin_p - Cin), (0, 0), (0, Lp - L)))
    xf = xf.reshape(Cin_p, NLp).astype(cdt)
    tT = jnp.transpose(t_emb.astype(f32)).astype(cdt)                   # (T, N)

    def conv_w(w, cin_p):   # (Cout, Cin, 3) -> (3, Cout_p, cin_p): one matmul slab per tap
        w = jnp.pad(w.astype(f32), ((0, Cout_p - w.shape[0]),
                                    (0, cin_p - w.shape[1]), (0, 0)))
        return jnp.transpose(w, (2, 0, 1)).astype(cdt)

    def col(v):             # (Cout,) -> (Cout_p, 1) f32 (zero pad; gamma pad 0 keeps pads 0)
        return jnp.pad(v.astype(f32).reshape(-1, 1), ((0, Cout_p - v.shape[0]), (0, 0)))

    def pad2(w, r, c):
        return jnp.pad(w.astype(f32), ((0, r - w.shape[0]), (0, c - w.shape[1])))

    w1f = conv_w(params["w1"], Cin_p)
    w2f = conv_w(params["w2"], Cout_p)
    wt = pad2(params["wt"], Cout_p, T).astype(cdt)
    if Cin == Cout:
        # PyTorch uses Identity for the residual path when in_channels == out_channels.
        wr, br = jnp.eye(Cout, dtype=f32), jnp.zeros((Cout,), f32)
    else:
        wr, br = params["wr"], params["br"]
    wrp = pad2(wr, Cout_p, Cin_p).astype(cdt)

    args = (xf, tT,
            w1f, col(params["b1"]), col(params["g1"]), col(params["beta1"]),
            w2f, col(params["b2"]), col(params["g2"]), col(params["beta2"]),
            wt, col(params["bt"]),
            wrp, col(br))

    # Right-size the scoped VMEM limit from the actual footprint (not a hard-coded 32 MiB).
    in_bytes = sum(int(a.size) * a.dtype.itemsize for a in args)
    out_bytes = Cout_p * NLp * 4
    act_bytes = (8 * Cout_p + 3 * Cin_p) * NLp * 4          # generous f32 intermediates
    needed = 2 * (in_bytes + out_bytes) + act_bytes + (4 << 20)
    try:
        cap = int(pltpu.get_tpu_info().vmem_capacity_bytes) - (8 << 20)
    except Exception:
        cap = 56 << 20                                      # safe on every generation (v7x)
    vmem_limit = int(min(max(needed, 16 << 20), cap))

    flops = 2 * NLp * Cout_p * (3 * Cin_p + 3 * Cout_p + Cin_p) + 2 * Cout_p * T * N
    cost = pl.CostEstimate(flops=int(flops),
                           transcendentals=int(2 * Cout_p * NLp + Cout_p * N),
                           bytes_accessed=int(in_bytes + out_bytes))

    def full_spec(shape):
        nd = len(shape)
        return pl.BlockSpec(shape, lambda *_, nd=nd: (0,) * nd)

    out = pl.pallas_call(
        functools.partial(_diffusion_block_kernel, seq_len=L, seq_pad=Lp),
        grid=(1,),
        in_specs=[full_spec(a.shape) for a in args],
        out_specs=full_spec((Cout_p, NLp)),
        out_shape=jax.ShapeDtypeStruct((Cout_p, NLp), f32),
        compiler_params=pltpu.CompilerParams(
            dimension_semantics=("arbitrary",),
            vmem_limit_bytes=vmem_limit),
        cost_estimate=cost,
    )(*args)

    # Lane-dense (Cout_p, N*Lp) -> (N, Cout, L): dead channel/length pads sliced in the same
    # wrapper-side transpose pass.
    return jnp.transpose(out.reshape(Cout_p, N, Lp)[:Cout, :, :L], (1, 0, 2))


if __name__ == "__main__":
    key = jax.random.PRNGKey(0)
    kx, kt, kp = jax.random.split(key, 3)

    N, Cin, Cout, L, T = 2, 4, 8, 16, 32
    x = jax.random.normal(kx, (N, Cin, L), jnp.float32)       # NCL input
    t_emb = jax.random.normal(kt, (N, T), jnp.float32)
    params = init_params(kp, Cin, Cout, T)

    out = diffusion_block(x, t_emb, params)
    jax.block_until_ready(out)
    assert out.shape == (N, Cout, L) and out.dtype == jnp.float32
    print("KERNEL_OK")
</pallas_src>

<mosaic_0001>
module attributes {stable_mosaic.version = 11 : i64} {
  func.func @_diffusion_block_kernel(%arg0: i32, %arg1: memref<16x256xbf16, #tpu.memory_space<vmem>>, %arg2: memref<32x2xbf16, #tpu.memory_space<vmem>>, %arg3: memref<3x16x16xbf16, #tpu.memory_space<vmem>>, %arg4: memref<16x1xf32, #tpu.memory_space<vmem>>, %arg5: memref<16x1xf32, #tpu.memory_space<vmem>>, %arg6: memref<16x1xf32, #tpu.memory_space<vmem>>, %arg7: memref<3x16x16xbf16, #tpu.memory_space<vmem>>, %arg8: memref<16x1xf32, #tpu.memory_space<vmem>>, %arg9: memref<16x1xf32, #tpu.memory_space<vmem>>, %arg10: memref<16x1xf32, #tpu.memory_space<vmem>>, %arg11: memref<16x32xbf16, #tpu.memory_space<vmem>>, %arg12: memref<16x1xf32, #tpu.memory_space<vmem>>, %arg13: memref<16x16xbf16, #tpu.memory_space<vmem>>, %arg14: memref<16x1xf32, #tpu.memory_space<vmem>>, %arg15: memref<16x256xf32, #tpu.memory_space<vmem>>) attributes {dimension_semantics = [#tpu.dimension_semantics<arbitrary>], iteration_bounds = array<i64: 1>, scalar_prefetch = 0 : i64, scratch_operands = 0 : i64, tpu.core_type = #tpu.core_type<tc>, window_params = [{pipeline_mode = #tpu.pipeline_mode<synchronous>, transform_indices = @transform_0, window_bounds = array<i64: 16, 256>}, {pipeline_mode = #tpu.pipeline_mode<synchronous>, transform_indices = @transform_1, window_bounds = array<i64: 32, 2>}, {pipeline_mode = #tpu.pipeline_mode<synchronous>, transform_indices = @transform_2, window_bounds = array<i64: 3, 16, 16>}, {pipeline_mode = #tpu.pipeline_mode<synchronous>, transform_indices = @transform_3, window_bounds = array<i64: 16, 1>}, {pipeline_mode = #tpu.pipeline_mode<synchronous>, transform_indices = @transform_4, window_bounds = array<i64: 16, 1>}, {pipeline_mode = #tpu.pipeline_mode<synchronous>, transform_indices = @transform_5, window_bounds = array<i64: 16, 1>}, {pipeline_mode = #tpu.pipeline_mode<synchronous>, transform_indices = @transform_6, window_bounds = array<i64: 3, 16, 16>}, {pipeline_mode = #tpu.pipeline_mode<synchronous>, transform_indices = @transform_7, window_bounds = array<i64: 16, 1>}, {pipeline_mode = #tpu.pipeline_mode<synchronous>, transform_indices = @transform_8, window_bounds = array<i64: 16, 1>}, {pipeline_mode = #tpu.pipeline_mode<synchronous>, transform_indices = @transform_9, window_bounds = array<i64: 16, 1>}, {pipeline_mode = #tpu.pipeline_mode<synchronous>, transform_indices = @transform_10, window_bounds = array<i64: 16, 32>}, {pipeline_mode = #tpu.pipeline_mode<synchronous>, transform_indices = @transform_11, window_bounds = array<i64: 16, 1>}, {pipeline_mode = #tpu.pipeline_mode<synchronous>, transform_indices = @transform_12, window_bounds = array<i64: 16, 16>}, {pipeline_mode = #tpu.pipeline_mode<synchronous>, transform_indices = @transform_13, window_bounds = array<i64: 16, 1>}, {pipeline_mode = #tpu.pipeline_mode<synchronous>, transform_indices = @transform_14, window_bounds = array<i64: 16, 256>}]} {
    %0 = tpu.iota {dimensions = array<i32: 1>} : vector<1x256xi32>
    %c128_i32 = arith.constant 128 : i32
    %c0_i32 = arith.constant 0 : i32
    %1 = arith.cmpi eq, %c128_i32, %c0_i32 : i32
    %c1_i32 = arith.constant 1 : i32
    %2 = arith.select %1, %c1_i32, %c128_i32 : i32
    %3 = vector.broadcast %2 : i32 to vector<1x256xi32>
    %4 = arith.remsi %0, %3 : vector<1x256xi32>
    %c0_i32_0 = arith.constant 0 : i32
    %5 = vector.broadcast %c0_i32_0 : i32 to vector<1x256xi32>
    %6 = arith.cmpi ne, %4, %5 : vector<1x256xi32>
    %c0_i32_1 = arith.constant 0 : i32
    %7 = vector.broadcast %c0_i32_1 : i32 to vector<1x256xi32>
    %8 = arith.cmpi slt, %4, %7 : vector<1x256xi32>
    %c0_i32_2 = arith.constant 0 : i32
    %9 = arith.cmpi slt, %2, %c0_i32_2 : i32
    %10 = vector.broadcast %9 : i1 to vector<1x256xi1>
    %11 = vector.broadcast %10 : vector<1x256xi1> to vector<1x256xi1>
    %12 = arith.xori %8, %11 : vector<1x256xi1>
    %13 = arith.andi %12, %6 : vector<1x256xi1>
    %14 = vector.broadcast %2 : i32 to vector<1x256xi32>
    %15 = arith.addi %4, %14 : vector<1x256xi32>
    %16 = arith.select %13, %15, %4 : vector<1x256xi1>, vector<1x256xi32>
    %c16_i32 = arith.constant 16 : i32
    %17 = vector.broadcast %c16_i32 : i32 to vector<1x256xi32>
    %18 = arith.cmpi slt, %16, %17 : vector<1x256xi32>
    %c0_i32_3 = arith.constant 0 : i32
    %19 = vector.broadcast %c0_i32_3 : i32 to vector<1x256xi32>
    %20 = arith.cmpi ne, %16, %19 : vector<1x256xi32>
    %c15_i32 = arith.constant 15 : i32
    %21 = vector.broadcast %c15_i32 : i32 to vector<1x256xi32>
    %22 = arith.cmpi ne, %16, %21 : vector<1x256xi32>
    %c0 = arith.constant 0 : index
    %c0_4 = arith.constant 0 : index
    %23 = vector.load %arg1[%c0, %c0_4] : memref<16x256xbf16, #tpu.memory_space<vmem>>, vector<16x256xbf16>
    %c0_5 = arith.constant 0 : index
    %c0_6 = arith.constant 0 : index
    %24 = vector.load %arg4[%c0_5, %c0_6] : memref<16x1xf32, #tpu.memory_space<vmem>>, vector<16x1xf32>
    %cst = arith.constant 0.000000e+00 : bf16
    %25 = vector.broadcast %cst : bf16 to vector<16x1xbf16>
    %26 = vector.extract_strided_slice %23 {offsets = [0, 0], sizes = [16, 255], strides = [1, 1]} : vector<16x256xbf16> to vector<16x255xbf16>
    %27 = tpu.concatenate %25, %26 in 1 : vector<16x1xbf16>, vector<16x255xbf16> -> vector<16x256xbf16>
    %cst_7 = arith.constant 0.000000e+00 : bf16
    %28 = vector.shape_cast %20 : vector<1x256xi1> to vector<1x256xi1>
    %29 = vector.broadcast %28 : vector<1x256xi1> to vector<16x256xi1>
    %30 = vector.broadcast %cst_7 : bf16 to vector<16x256xbf16>
    %31 = arith.select %29, %27, %30 : vector<16x256xi1>, vector<16x256xbf16>
    %32 = vector.extract_strided_slice %23 {offsets = [0, 1], sizes = [16, 255], strides = [1, 1]} : vector<16x256xbf16> to vector<16x255xbf16>
    %33 = tpu.concatenate %32, %25 in 1 : vector<16x255xbf16>, vector<16x1xbf16> -> vector<16x256xbf16>
    %cst_8 = arith.constant 0.000000e+00 : bf16
    %34 = vector.shape_cast %22 : vector<1x256xi1> to vector<1x256xi1>
    %35 = vector.broadcast %34 : vector<1x256xi1> to vector<16x256xi1>
    %36 = vector.broadcast %cst_8 : bf16 to vector<16x256xbf16>
    %37 = arith.select %35, %33, %36 : vector<16x256xi1>, vector<16x256xbf16>
    %c1 = arith.constant 1 : index
    %c0_9 = arith.constant 0 : index
    %c0_10 = arith.constant 0 : index
    %38 = vector.load %arg3[%c1, %c0_9, %c0_10] : memref<3x16x16xbf16, #tpu.memory_space<vmem>>, vector<1x16x16xbf16>
    %39 = vector.shape_cast %38 : vector<1x16x16xbf16> to vector<16x16xbf16>
    %cst_11 = arith.constant dense<0.000000e+00> : vector<16x256xf32>
    %40 = tpu.matmul %39, %23, %cst_11 {dimension_numbers = #tpu.dot_dimension_numbers<[1], [0], [0], [1], [0, 0, 1, 1], [], []>} : vector<16x16xbf16>, vector<16x256xbf16>, vector<16x256xf32> -> vector<16x256xf32>
    %c0_12 = arith.constant 0 : index
    %c0_13 = arith.constant 0 : index
    %c0_14 = arith.constant 0 : index
    %41 = vector.load %arg3[%c0_12, %c0_13, %c0_14] : memref<3x16x16xbf16, #tpu.memory_space<vmem>>, vector<1x16x16xbf16>
    %42 = vector.shape_cast %41 : vector<1x16x16xbf16> to vector<16x16xbf16>
    %cst_15 = arith.constant dense<0.000000e+00> : vector<16x256xf32>
    %43 = tpu.matmul %42, %31, %cst_15 {dimension_numbers = #tpu.dot_dimension_numbers<[1], [0], [0], [1], [0, 0, 1, 1], [], []>} : vector<16x16xbf16>, vector<16x256xbf16>, vector<16x256xf32> -> vector<16x256xf32>
    %44 = arith.addf %40, %43 : vector<16x256xf32>
    %c2 = arith.constant 2 : index
    %c0_16 = arith.constant 0 : index
    %c0_17 = arith.constant 0 : index
    %45 = vector.load %arg3[%c2, %c0_16, %c0_17] : memref<3x16x16xbf16, #tpu.memory_space<vmem>>, vector<1x16x16xbf16>
    %46 = vector.shape_cast %45 : vector<1x16x16xbf16> to vector<16x16xbf16>
    %cst_18 = arith.constant dense<0.000000e+00> : vector<16x256xf32>
    %47 = tpu.matmul %46, %37, %cst_18 {dimension_numbers = #tpu.dot_dimension_numbers<[1], [0], [0], [1], [0, 0, 1, 1], [], []>} : vector<16x16xbf16>, vector<16x256xbf16>, vector<16x256xf32> -> vector<16x256xf32>
    %48 = arith.addf %44, %47 : vector<16x256xf32>
    %49 = vector.broadcast %24 : vector<16x1xf32> to vector<16x256xf32>
    %50 = arith.addf %48, %49 : vector<16x256xf32>
    %c0_19 = arith.constant 0 : index
    %c0_20 = arith.constant 0 : index
    %51 = vector.load %arg5[%c0_19, %c0_20] : memref<16x1xf32, #tpu.memory_space<vmem>>, vector<16x1xf32>
    %c0_21 = arith.constant 0 : index
    %c0_22 = arith.constant 0 : index
    %52 = vector.load %arg6[%c0_21, %c0_22] : memref<16x1xf32, #tpu.memory_space<vmem>>, vector<16x1xf32>
    %cst_23 = arith.constant 0.000000e+00 : f32
    %53 = vector.shape_cast %18 : vector<1x256xi1> to vector<1x256xi1>
    %54 = vector.broadcast %53 : vector<1x256xi1> to vector<16x256xi1>
    %55 = vector.broadcast %cst_23 : f32 to vector<16x256xf32>
    %56 = arith.select %54, %50, %55 : vector<16x256xi1>, vector<16x256xf32>
    %cst_24 = arith.constant dense<0.000000e+00> : vector<16xf32>
    %57 = vector.multi_reduction <add>, %56, %cst_24 [1] : vector<16x256xf32> to vector<16xf32>
    %58 = vector.shape_cast %57 : vector<16xf32> to vector<16x1xf32>
    %cst_25 = arith.constant 3.200000e+01 : f32
    %59 = vector.broadcast %cst_25 : f32 to vector<16x1xf32>
    %60 = arith.divf %58, %59 : vector<16x1xf32>
    %61 = vector.broadcast %60 : vector<16x1xf32> to vector<16x256xf32>
    %62 = arith.subf %50, %61 : vector<16x256xf32>
    %cst_26 = arith.constant 0.000000e+00 : f32
    %63 = vector.shape_cast %18 : vector<1x256xi1> to vector<1x256xi1>
    %64 = vector.broadcast %63 : vector<1x256xi1> to vector<16x256xi1>
    %65 = vector.broadcast %cst_26 : f32 to vector<16x256xf32>
    %66 = arith.select %64, %62, %65 : vector<16x256xi1>, vector<16x256xf32>
    %67 = arith.mulf %66, %66 : vector<16x256xf32>
    %cst_27 = arith.constant dense<0.000000e+00> : vector<16xf32>
    %68 = vector.multi_reduction <add>, %67, %cst_27 [1] : vector<16x256xf32> to vector<16xf32>
    %69 = vector.shape_cast %68 : vector<16xf32> to vector<16x1xf32>
    %cst_28 = arith.constant 3.200000e+01 : f32
    %70 = vector.broadcast %cst_28 : f32 to vector<16x1xf32>
    %71 = arith.divf %69, %70 : vector<16x1xf32>
    %cst_29 = arith.constant 9.99999974E-6 : f32
    %72 = vector.broadcast %cst_29 : f32 to vector<16x1xf32>
    %73 = arith.addf %71, %72 : vector<16x1xf32>
    %74 = math.rsqrt %73 : vector<16x1xf32>
    %75 = arith.mulf %74, %51 : vector<16x1xf32>
    %76 = arith.mulf %60, %75 : vector<16x1xf32>
    %77 = arith.subf %52, %76 : vector<16x1xf32>
    %78 = vector.broadcast %75 : vector<16x1xf32> to vector<16x256xf32>
    %79 = arith.mulf %50, %78 : vector<16x256xf32>
    %80 = vector.broadcast %77 : vector<16x1xf32> to vector<16x256xf32>
    %81 = arith.addf %79, %80 : vector<16x256xf32>
    %cst_30 = arith.constant 5.000000e-01 : f32
    %82 = vector.broadcast %cst_30 : f32 to vector<16x256xf32>
    %83 = arith.mulf %82, %81 : vector<16x256xf32>
    %cst_31 = arith.constant 0.707106769 : f32
    %84 = vector.broadcast %cst_31 : f32 to vector<16x256xf32>
    %85 = arith.mulf %81, %84 : vector<16x256xf32>
    %86 = math.absf %85 : vector<16x256xf32>
    %cst_32 = arith.constant 0.327591091 : f32
    %87 = vector.broadcast %cst_32 : f32 to vector<16x256xf32>
    %88 = arith.mulf %87, %86 : vector<16x256xf32>
    %cst_33 = arith.constant 1.000000e+00 : f32
    %89 = vector.broadcast %cst_33 : f32 to vector<16x256xf32>
    %90 = arith.addf %89, %88 : vector<16x256xf32>
    %cst_34 = arith.constant 1.000000e+00 : f32
    %91 = vector.broadcast %cst_34 : f32 to vector<16x256xf32>
    %92 = arith.divf %91, %90 : vector<16x256xf32>
    %cst_35 = arith.constant 1.06140542 : f32
    %93 = vector.broadcast %cst_35 : f32 to vector<16x256xf32>
    %94 = arith.mulf %92, %93 : vector<16x256xf32>
    %cst_36 = arith.constant -1.45315206 : f32
    %95 = vector.broadcast %cst_36 : f32 to vector<16x256xf32>
    %96 = arith.addf %95, %94 : vector<16x256xf32>
    %97 = arith.mulf %92, %96 : vector<16x256xf32>
    %cst_37 = arith.constant 1.42141378 : f32
    %98 = vector.broadcast %cst_37 : f32 to vector<16x256xf32>
    %99 = arith.addf %98, %97 : vector<16x256xf32>
    %100 = arith.mulf %92, %99 : vector<16x256xf32>
    %cst_38 = arith.constant -0.284496725 : f32
    %101 = vector.broadcast %cst_38 : f32 to vector<16x256xf32>
    %102 = arith.addf %101, %100 : vector<16x256xf32>
    %103 = arith.mulf %92, %102 : vector<16x256xf32>
    %cst_39 = arith.constant 0.254829586 : f32
    %104 = vector.broadcast %cst_39 : f32 to vector<16x256xf32>
    %105 = arith.addf %104, %103 : vector<16x256xf32>
    %106 = arith.mulf %92, %105 : vector<16x256xf32>
    %cst_40 = arith.constant 0.000000e+00 : f32
    %107 = vector.broadcast %cst_40 : f32 to vector<16x256xf32>
    %108 = arith.subf %107, %86 : vector<16x256xf32>
    %109 = arith.mulf %108, %86 : vector<16x256xf32>
    %110 = math.exp %109 : vector<16x256xf32>
    %111 = arith.mulf %106, %110 : vector<16x256xf32>
    %cst_41 = arith.constant 1.000000e+00 : f32
    %112 = vector.broadcast %cst_41 : f32 to vector<16x256xf32>
    %113 = arith.subf %112, %111 : vector<16x256xf32>
    %cst_42 = arith.constant 0.000000e+00 : f32
    %114 = vector.broadcast %cst_42 : f32 to vector<16x256xf32>
    %115 = arith.cmpf oge, %85, %114 : vector<16x256xf32>
    %cst_43 = arith.constant 0.000000e+00 : f32
    %116 = vector.broadcast %cst_43 : f32 to vector<16x256xf32>
    %117 = arith.subf %116, %113 : vector<16x256xf32>
    %118 = arith.select %115, %113, %117 : vector<16x256xi1>, vector<16x256xf32>
    %cst_44 = arith.constant 1.000000e+00 : f32
    %119 = vector.broadcast %cst_44 : f32 to vector<16x256xf32>
    %120 = arith.addf %119, %118 : vector<16x256xf32>
    %121 = arith.mulf %83, %120 : vector<16x256xf32>
    %c0_45 = arith.constant 0 : index
    %c0_46 = arith.constant 0 : index
    %122 = vector.load %arg11[%c0_45, %c0_46] : memref<16x32xbf16, #tpu.memory_space<vmem>>, vector<16x32xbf16>
    %c0_47 = arith.constant 0 : index
    %c0_48 = arith.constant 0 : index
    %123 = vector.load %arg2[%c0_47, %c0_48] : memref<32x2xbf16, #tpu.memory_space<vmem>>, vector<32x2xbf16>
    %cst_49 = arith.constant dense<0.000000e+00> : vector<16x2xf32>
    %124 = tpu.matmul %122, %123, %cst_49 {dimension_numbers = #tpu.dot_dimension_numbers<[1], [0], [0], [1], [0, 0, 1, 1], [], []>} : vector<16x32xbf16>, vector<32x2xbf16>, vector<16x2xf32> -> vector<16x2xf32>
    %c0_50 = arith.constant 0 : index
    %c0_51 = arith.constant 0 : index
    %125 = vector.load %arg12[%c0_50, %c0_51] : memref<16x1xf32, #tpu.memory_space<vmem>>, vector<16x1xf32>
    %126 = vector.broadcast %125 : vector<16x1xf32> to vector<16x2xf32>
    %127 = arith.addf %124, %126 : vector<16x2xf32>
    %cst_52 = arith.constant 5.000000e-01 : f32
    %128 = vector.broadcast %cst_52 : f32 to vector<16x2xf32>
    %129 = arith.mulf %128, %127 : vector<16x2xf32>
    %cst_53 = arith.constant 0.707106769 : f32
    %130 = vector.broadcast %cst_53 : f32 to vector<16x2xf32>
    %131 = arith.mulf %127, %130 : vector<16x2xf32>
    %132 = math.absf %131 : vector<16x2xf32>
    %cst_54 = arith.constant 0.327591091 : f32
    %133 = vector.broadcast %cst_54 : f32 to vector<16x2xf32>
    %134 = arith.mulf %133, %132 : vector<16x2xf32>
    %cst_55 = arith.constant 1.000000e+00 : f32
    %135 = vector.broadcast %cst_55 : f32 to vector<16x2xf32>
    %136 = arith.addf %135, %134 : vector<16x2xf32>
    %cst_56 = arith.constant 1.000000e+00 : f32
    %137 = vector.broadcast %cst_56 : f32 to vector<16x2xf32>
    %138 = arith.divf %137, %136 : vector<16x2xf32>
    %cst_57 = arith.constant 1.06140542 : f32
    %139 = vector.broadcast %cst_57 : f32 to vector<16x2xf32>
    %140 = arith.mulf %138, %139 : vector<16x2xf32>
    %cst_58 = arith.constant -1.45315206 : f32
    %141 = vector.broadcast %cst_58 : f32 to vector<16x2xf32>
    %142 = arith.addf %141, %140 : vector<16x2xf32>
    %143 = arith.mulf %138, %142 : vector<16x2xf32>
    %cst_59 = arith.constant 1.42141378 : f32
    %144 = vector.broadcast %cst_59 : f32 to vector<16x2xf32>
    %145 = arith.addf %144, %143 : vector<16x2xf32>
    %146 = arith.mulf %138, %145 : vector<16x2xf32>
    %cst_60 = arith.constant -0.284496725 : f32
    %147 = vector.broadcast %cst_60 : f32 to vector<16x2xf32>
    %148 = arith.addf %147, %146 : vector<16x2xf32>
    %149 = arith.mulf %138, %148 : vector<16x2xf32>
    %cst_61 = arith.constant 0.254829586 : f32
    %150 = vector.broadcast %cst_61 : f32 to vector<16x2xf32>
    %151 = arith.addf %150, %149 : vector<16x2xf32>
    %152 = arith.mulf %138, %151 : vector<16x2xf32>
    %cst_62 = arith.constant 0.000000e+00 : f32
    %153 = vector.broadcast %cst_62 : f32 to vector<16x2xf32>
    %154 = arith.subf %153, %132 : vector<16x2xf32>
    %155 = arith.mulf %154, %132 : vector<16x2xf32>
    %156 = math.exp %155 : vector<16x2xf32>
    %157 = arith.mulf %152, %156 : vector<16x2xf32>
    %cst_63 = arith.constant 1.000000e+00 : f32
    %158 = vector.broadcast %cst_63 : f32 to vector<16x2xf32>
    %159 = arith.subf %158, %157 : vector<16x2xf32>
    %cst_64 = arith.constant 0.000000e+00 : f32
    %160 = vector.broadcast %cst_64 : f32 to vector<16x2xf32>
    %161 = arith.cmpf oge, %131, %160 : vector<16x2xf32>
    %cst_65 = arith.constant 0.000000e+00 : f32
    %162 = vector.broadcast %cst_65 : f32 to vector<16x2xf32>
    %163 = arith.subf %162, %159 : vector<16x2xf32>
    %164 = arith.select %161, %159, %163 : vector<16x2xi1>, vector<16x2xf32>
    %cst_66 = arith.constant 1.000000e+00 : f32
    %165 = vector.broadcast %cst_66 : f32 to vector<16x2xf32>
    %166 = arith.addf %165, %164 : vector<16x2xf32>
    %167 = arith.mulf %129, %166 : vector<16x2xf32>
    %168 = vector.extract_strided_slice %121 {offsets = [0, 0], sizes = [16, 128], strides = [1, 1]} : vector<16x256xf32> to vector<16x128xf32>
    %169 = vector.extract_strided_slice %167 {offsets = [0, 0], sizes = [16, 1], strides = [1, 1]} : vector<16x2xf32> to vector<16x1xf32>
    %170 = vector.broadcast %169 : vector<16x1xf32> to vector<16x128xf32>
    %171 = arith.addf %168, %170 : vector<16x128xf32>
    %172 = vector.extract_strided_slice %121 {offsets = [0, 128], sizes = [16, 128], strides = [1, 1]} : vector<16x256xf32> to vector<16x128xf32>
    %173 = vector.extract_strided_slice %167 {offsets = [0, 1], sizes = [16, 1], strides = [1, 1]} : vector<16x2xf32> to vector<16x1xf32>
    %174 = vector.broadcast %173 : vector<16x1xf32> to vector<16x128xf32>
    %175 = arith.addf %172, %174 : vector<16x128xf32>
    %176 = tpu.concatenate %171, %175 in 1 : vector<16x128xf32>, vector<16x128xf32> -> vector<16x256xf32>
    %cst_67 = arith.constant 0.000000e+00 : f32
    %177 = vector.shape_cast %18 : vector<1x256xi1> to vector<1x256xi1>
    %178 = vector.broadcast %177 : vector<1x256xi1> to vector<16x256xi1>
    %179 = vector.broadcast %cst_67 : f32 to vector<16x256xf32>
    %180 = arith.select %178, %176, %179 : vector<16x256xi1>, vector<16x256xf32>
    %181 = arith.truncf %180 : vector<16x256xf32> to vector<16x256xbf16>
    %c0_68 = arith.constant 0 : index
    %c0_69 = arith.constant 0 : index
    %182 = vector.load %arg8[%c0_68, %c0_69] : memref<16x1xf32, #tpu.memory_space<vmem>>, vector<16x1xf32>
    %cst_70 = arith.constant 0.000000e+00 : bf16
    %183 = vector.broadcast %cst_70 : bf16 to vector<16x1xbf16>
    %184 = vector.extract_strided_slice %181 {offsets = [0, 0], sizes = [16, 255], strides = [1, 1]} : vector<16x256xbf16> to vector<16x255xbf16>
    %185 = tpu.concatenate %183, %184 in 1 : vector<16x1xbf16>, vector<16x255xbf16> -> vector<16x256xbf16>
    %cst_71 = arith.constant 0.000000e+00 : bf16
    %186 = vector.shape_cast %20 : vector<1x256xi1> to vector<1x256xi1>
    %187 = vector.broadcast %186 : vector<1x256xi1> to vector<16x256xi1>
    %188 = vector.broadcast %cst_71 : bf16 to vector<16x256xbf16>
    %189 = arith.select %187, %185, %188 : vector<16x256xi1>, vector<16x256xbf16>
    %190 = vector.extract_strided_slice %181 {offsets = [0, 1], sizes = [16, 255], strides = [1, 1]} : vector<16x256xbf16> to vector<16x255xbf16>
    %191 = tpu.concatenate %190, %183 in 1 : vector<16x255xbf16>, vector<16x1xbf16> -> vector<16x256xbf16>
    %cst_72 = arith.constant 0.000000e+00 : bf16
    %192 = vector.shape_cast %22 : vector<1x256xi1> to vector<1x256xi1>
    %193 = vector.broadcast %192 : vector<1x256xi1> to vector<16x256xi1>
    %194 = vector.broadcast %cst_72 : bf16 to vector<16x256xbf16>
    %195 = arith.select %193, %191, %194 : vector<16x256xi1>, vector<16x256xbf16>
    %c1_73 = arith.constant 1 : index
    %c0_74 = arith.constant 0 : index
    %c0_75 = arith.constant 0 : index
    %196 = vector.load %arg7[%c1_73, %c0_74, %c0_75] : memref<3x16x16xbf16, #tpu.memory_space<vmem>>, vector<1x16x16xbf16>
    %197 = vector.shape_cast %196 : vector<1x16x16xbf16> to vector<16x16xbf16>
    %cst_76 = arith.constant dense<0.000000e+00> : vector<16x256xf32>
    %198 = tpu.matmul %197, %181, %cst_76 {dimension_numbers = #tpu.dot_dimension_numbers<[1], [0], [0], [1], [0, 0, 1, 1], [], []>} : vector<16x16xbf16>, vector<16x256xbf16>, vector<16x256xf32> -> vector<16x256xf32>
    %c0_77 = arith.constant 0 : index
    %c0_78 = arith.constant 0 : index
    %c0_79 = arith.constant 0 : index
    %199 = vector.load %arg7[%c0_77, %c0_78, %c0_79] : memref<3x16x16xbf16, #tpu.memory_space<vmem>>, vector<1x16x16xbf16>
    %200 = vector.shape_cast %199 : vector<1x16x16xbf16> to vector<16x16xbf16>
    %cst_80 = arith.constant dense<0.000000e+00> : vector<16x256xf32>
    %201 = tpu.matmul %200, %189, %cst_80 {dimension_numbers = #tpu.dot_dimension_numbers<[1], [0], [0], [1], [0, 0, 1, 1], [], []>} : vector<16x16xbf16>, vector<16x256xbf16>, vector<16x256xf32> -> vector<16x256xf32>
    %202 = arith.addf %198, %201 : vector<16x256xf32>
    %c2_81 = arith.constant 2 : index
    %c0_82 = arith.constant 0 : index
    %c0_83 = arith.constant 0 : index
    %203 = vector.load %arg7[%c2_81, %c0_82, %c0_83] : memref<3x16x16xbf16, #tpu.memory_space<vmem>>, vector<1x16x16xbf16>
    %204 = vector.shape_cast %203 : vector<1x16x16xbf16> to vector<16x16xbf16>
    %cst_84 = arith.constant dense<0.000000e+00> : vector<16x256xf32>
    %205 = tpu.matmul %204, %195, %cst_84 {dimension_numbers = #tpu.dot_dimension_numbers<[1], [0], [0], [1], [0, 0, 1, 1], [], []>} : vector<16x16xbf16>, vector<16x256xbf16>, vector<16x256xf32> -> vector<16x256xf32>
    %206 = arith.addf %202, %205 : vector<16x256xf32>
    %207 = vector.broadcast %182 : vector<16x1xf32> to vector<16x256xf32>
    %208 = arith.addf %206, %207 : vector<16x256xf32>
    %c0_85 = arith.constant 0 : index
    %c0_86 = arith.constant 0 : index
    %209 = vector.load %arg9[%c0_85, %c0_86] : memref<16x1xf32, #tpu.memory_space<vmem>>, vector<16x1xf32>
    %c0_87 = arith.constant 0 : index
    %c0_88 = arith.constant 0 : index
    %210 = vector.load %arg10[%c0_87, %c0_88] : memref<16x1xf32, #tpu.memory_space<vmem>>, vector<16x1xf32>
    %cst_89 = arith.constant 0.000000e+00 : f32
    %211 = vector.shape_cast %18 : vector<1x256xi1> to vector<1x256xi1>
    %212 = vector.broadcast %211 : vector<1x256xi1> to vector<16x256xi1>
    %213 = vector.broadcast %cst_89 : f32 to vector<16x256xf32>
    %214 = arith.select %212, %208, %213 : vector<16x256xi1>, vector<16x256xf32>
    %cst_90 = arith.constant dense<0.000000e+00> : vector<16xf32>
    %215 = vector.multi_reduction <add>, %214, %cst_90 [1] : vector<16x256xf32> to vector<16xf32>
    %216 = vector.shape_cast %215 : vector<16xf32> to vector<16x1xf32>
    %cst_91 = arith.constant 3.200000e+01 : f32
    %217 = vector.broadcast %cst_91 : f32 to vector<16x1xf32>
    %218 = arith.divf %216, %217 : vector<16x1xf32>
    %219 = vector.broadcast %218 : vector<16x1xf32> to vector<16x256xf32>
    %220 = arith.subf %208, %219 : vector<16x256xf32>
    %cst_92 = arith.constant 0.000000e+00 : f32
    %221 = vector.shape_cast %18 : vector<1x256xi1> to vector<1x256xi1>
    %222 = vector.broadcast %221 : vector<1x256xi1> to vector<16x256xi1>
    %223 = vector.broadcast %cst_92 : f32 to vector<16x256xf32>
    %224 = arith.select %222, %220, %223 : vector<16x256xi1>, vector<16x256xf32>
    %225 = arith.mulf %224, %224 : vector<16x256xf32>
    %cst_93 = arith.constant dense<0.000000e+00> : vector<16xf32>
    %226 = vector.multi_reduction <add>, %225, %cst_93 [1] : vector<16x256xf32> to vector<16xf32>
    %227 = vector.shape_cast %226 : vector<16xf32> to vector<16x1xf32>
    %cst_94 = arith.constant 3.200000e+01 : f32
    %228 = vector.broadcast %cst_94 : f32 to vector<16x1xf32>
    %229 = arith.divf %227, %228 : vector<16x1xf32>
    %cst_95 = arith.constant 9.99999974E-6 : f32
    %230 = vector.broadcast %cst_95 : f32 to vector<16x1xf32>
    %231 = arith.addf %229, %230 : vector<16x1xf32>
    %232 = math.rsqrt %231 : vector<16x1xf32>
    %233 = arith.mulf %232, %209 : vector<16x1xf32>
    %234 = arith.mulf %218, %233 : vector<16x1xf32>
    %235 = arith.subf %210, %234 : vector<16x1xf32>
    %c0_96 = arith.constant 0 : index
    %c0_97 = arith.constant 0 : index
    %236 = vector.load %arg13[%c0_96, %c0_97] : memref<16x16xbf16, #tpu.memory_space<vmem>>, vector<16x16xbf16>
    %cst_98 = arith.constant dense<0.000000e+00> : vector<16x256xf32>
    %237 = tpu.matmul %236, %23, %cst_98 {dimension_numbers = #tpu.dot_dimension_numbers<[1], [0], [0], [1], [0, 0, 1, 1], [], []>} : vector<16x16xbf16>, vector<16x256xbf16>, vector<16x256xf32> -> vector<16x256xf32>
    %c0_99 = arith.constant 0 : index
    %c0_100 = arith.constant 0 : index
    %238 = vector.load %arg14[%c0_99, %c0_100] : memref<16x1xf32, #tpu.memory_space<vmem>>, vector<16x1xf32>
    %239 = vector.broadcast %238 : vector<16x1xf32> to vector<16x256xf32>
    %240 = arith.addf %237, %239 : vector<16x256xf32>
    %241 = vector.broadcast %233 : vector<16x1xf32> to vector<16x256xf32>
    %242 = arith.mulf %208, %241 : vector<16x256xf32>
    %243 = vector.broadcast %235 : vector<16x1xf32> to vector<16x256xf32>
    %244 = arith.addf %242, %243 : vector<16x256xf32>
    %cst_101 = arith.constant 5.000000e-01 : f32
    %245 = vector.broadcast %cst_101 : f32 to vector<16x256xf32>
    %246 = arith.mulf %245, %244 : vector<16x256xf32>
    %cst_102 = arith.constant 0.707106769 : f32
    %247 = vector.broadcast %cst_102 : f32 to vector<16x256xf32>
    %248 = arith.mulf %244, %247 : vector<16x256xf32>
    %249 = math.absf %248 : vector<16x256xf32>
    %cst_103 = arith.constant 0.327591091 : f32
    %250 = vector.broadcast %cst_103 : f32 to vector<16x256xf32>
    %251 = arith.mulf %250, %249 : vector<16x256xf32>
    %cst_104 = arith.constant 1.000000e+00 : f32
    %252 = vector.broadcast %cst_104 : f32 to vector<16x256xf32>
    %253 = arith.addf %252, %251 : vector<16x256xf32>
    %cst_105 = arith.constant 1.000000e+00 : f32
    %254 = vector.broadcast %cst_105 : f32 to vector<16x256xf32>
    %255 = arith.divf %254, %253 : vector<16x256xf32>
    %cst_106 = arith.constant 1.06140542 : f32
    %256 = vector.broadcast %cst_106 : f32 to vector<16x256xf32>
    %257 = arith.mulf %255, %256 : vector<16x256xf32>
    %cst_107 = arith.constant -1.45315206 : f32
    %258 = vector.broadcast %cst_107 : f32 to vector<16x256xf32>
    %259 = arith.addf %258, %257 : vector<16x256xf32>
    %260 = arith.mulf %255, %259 : vector<16x256xf32>
    %cst_108 = arith.constant 1.42141378 : f32
    %261 = vector.broadcast %cst_108 : f32 to vector<16x256xf32>
    %262 = arith.addf %261, %260 : vector<16x256xf32>
    %263 = arith.mulf %255, %262 : vector<16x256xf32>
    %cst_109 = arith.constant -0.284496725 : f32
    %264 = vector.broadcast %cst_109 : f32 to vector<16x256xf32>
    %265 = arith.addf %264, %263 : vector<16x256xf32>
    %266 = arith.mulf %255, %265 : vector<16x256xf32>
    %cst_110 = arith.constant 0.254829586 : f32
    %267 = vector.broadcast %cst_110 : f32 to vector<16x256xf32>
    %268 = arith.addf %267, %266 : vector<16x256xf32>
    %269 = arith.mulf %255, %268 : vector<16x256xf32>
    %cst_111 = arith.constant 0.000000e+00 : f32
    %270 = vector.broadcast %cst_111 : f32 to vector<16x256xf32>
    %271 = arith.subf %270, %249 : vector<16x256xf32>
    %272 = arith.mulf %271, %249 : vector<16x256xf32>
    %273 = math.exp %272 : vector<16x256xf32>
    %274 = arith.mulf %269, %273 : vector<16x256xf32>
    %cst_112 = arith.constant 1.000000e+00 : f32
    %275 = vector.broadcast %cst_112 : f32 to vector<16x256xf32>
    %276 = arith.subf %275, %274 : vector<16x256xf32>
    %cst_113 = arith.constant 0.000000e+00 : f32
    %277 = vector.broadcast %cst_113 : f32 to vector<16x256xf32>
    %278 = arith.cmpf oge, %248, %277 : vector<16x256xf32>
    %cst_114 = arith.constant 0.000000e+00 : f32
    %279 = vector.broadcast %cst_114 : f32 to vector<16x256xf32>
    %280 = arith.subf %279, %276 : vector<16x256xf32>
    %281 = arith.select %278, %276, %280 : vector<16x256xi1>, vector<16x256xf32>
    %cst_115 = arith.constant 1.000000e+00 : f32
    %282 = vector.broadcast %cst_115 : f32 to vector<16x256xf32>
    %283 = arith.addf %282, %281 : vector<16x256xf32>
    %284 = arith.mulf %246, %283 : vector<16x256xf32>
    %285 = arith.addf %284, %240 : vector<16x256xf32>
    %c0_116 = arith.constant 0 : index
    %c0_117 = arith.constant 0 : index
    %286 = vector.load %arg15[%c0_116, %c0_117] : memref<16x256xf32, #tpu.memory_space<vmem>>, vector<16x256xf32>
    tpu.vector_store %arg15[%c0_116, %c0_117], %285 {strides = array<i32>} : memref<16x256xf32, #tpu.memory_space<vmem>>, vector<16x256xf32>,
    return
  }
  func.func @transform_0(%arg0: i32) -> (i32, i32) {
    %c0_i32 = arith.constant 0 : i32
    %c0_i32_0 = arith.constant 0 : i32
    %c0_i32_1 = arith.constant 0 : i32
    return %c0_i32, %c0_i32_0 : i32, i32
  }
  func.func @transform_1(%arg0: i32) -> (i32, i32) {
    %c0_i32 = arith.constant 0 : i32
    %c0_i32_0 = arith.constant 0 : i32
    %c0_i32_1 = arith.constant 0 : i32
    return %c0_i32, %c0_i32_0 : i32, i32
  }
  func.func @transform_2(%arg0: i32) -> (i32, i32, i32) {
    %c0_i32 = arith.constant 0 : i32
    %c0_i32_0 = arith.constant 0 : i32
    %c0_i32_1 = arith.constant 0 : i32
    %c0_i32_2 = arith.constant 0 : i32
    return %c0_i32, %c0_i32_0, %c0_i32_1 : i32, i32, i32
  }
  func.func @transform_3(%arg0: i32) -> (i32, i32) {
    %c0_i32 = arith.constant 0 : i32
    %c0_i32_0 = arith.constant 0 : i32
    %c0_i32_1 = arith.constant 0 : i32
    return %c0_i32, %c0_i32_0 : i32, i32
  }
  func.func @transform_4(%arg0: i32) -> (i32, i32) {
    %c0_i32 = arith.constant 0 : i32
    %c0_i32_0 = arith.constant 0 : i32
    %c0_i32_1 = arith.constant 0 : i32
    return %c0_i32, %c0_i32_0 : i32, i32
  }
  func.func @transform_5(%arg0: i32) -> (i32, i32) {
    %c0_i32 = arith.constant 0 : i32
    %c0_i32_0 = arith.constant 0 : i32
    %c0_i32_1 = arith.constant 0 : i32
    return %c0_i32, %c0_i32_0 : i32, i32
  }
  func.func @transform_6(%arg0: i32) -> (i32, i32, i32) {
    %c0_i32 = arith.constant 0 : i32
    %c0_i32_0 = arith.constant 0 : i32
    %c0_i32_1 = arith.constant 0 : i32
    %c0_i32_2 = arith.constant 0 : i32
    return %c0_i32, %c0_i32_0, %c0_i32_1 : i32, i32, i32
  }
  func.func @transform_7(%arg0: i32) -> (i32, i32) {
    %c0_i32 = arith.constant 0 : i32
    %c0_i32_0 = arith.constant 0 : i32
    %c0_i32_1 = arith.constant 0 : i32
    return %c0_i32, %c0_i32_0 : i32, i32
  }
  func.func @transform_8(%arg0: i32) -> (i32, i32) {
    %c0_i32 = arith.constant 0 : i32
    %c0_i32_0 = arith.constant 0 : i32
    %c0_i32_1 = arith.constant 0 : i32
    return %c0_i32, %c0_i32_0 : i32, i32
  }
  func.func @transform_9(%arg0: i32) -> (i32, i32) {
    %c0_i32 = arith.constant 0 : i32
    %c0_i32_0 = arith.constant 0 : i32
    %c0_i32_1 = arith.constant 0 : i32
    return %c0_i32, %c0_i32_0 : i32, i32
  }
  func.func @transform_10(%arg0: i32) -> (i32, i32) {
    %c0_i32 = arith.constant 0 : i32
    %c0_i32_0 = arith.constant 0 : i32
    %c0_i32_1 = arith.constant 0 : i32
    return %c0_i32, %c0_i32_0 : i32, i32
  }
  func.func @transform_11(%arg0: i32) -> (i32, i32) {
    %c0_i32 = arith.constant 0 : i32
    %c0_i32_0 = arith.constant 0 : i32
    %c0_i32_1 = arith.constant 0 : i32
    return %c0_i32, %c0_i32_0 : i32, i32
  }
  func.func @transform_12(%arg0: i32) -> (i32, i32) {
    %c0_i32 = arith.constant 0 : i32
    %c0_i32_0 = arith.constant 0 : i32
    %c0_i32_1 = arith.constant 0 : i32
    return %c0_i32, %c0_i32_0 : i32, i32
  }
  func.func @transform_13(%arg0: i32) -> (i32, i32) {
    %c0_i32 = arith.constant 0 : i32
    %c0_i32_0 = arith.constant 0 : i32
    %c0_i32_1 = arith.constant 0 : i32
    return %c0_i32, %c0_i32_0 : i32, i32
  }
  func.func @transform_14(%arg0: i32) -> (i32, i32) {
    %c0_i32 = arith.constant 0 : i32
    %c0_i32_0 = arith.constant 0 : i32
    %c0_i32_1 = arith.constant 0 : i32
    return %c0_i32, %c0_i32_0 : i32, i32
  }
}

</mosaic_0001>

<bundles_post_ra>
// kernel: tpu_custom_call.1
= control target key start
LH: loop header
LB: loop body
LE: loop exit
PB: predicated region body
PF: predicated region fallthrough
CT: control target
= control target key end

     0   :  { %s1327_s15 = smov 1   ;;  %s1328_s18 = smov 127   ;;  %v1329_v2 = vmov 0   ;;  %s1766_s0 = inlined_call_operand.vmem [shape: bf16[16,256], index: 0, kind: input, shape index: {}]   ;;  %s1767_s1 = inlined_call_operand.vmem [shape: bf16[32,2], index: 1, kind: input, shape index: {}]   ;;  %s1768_s2 = inlined_call_operand.vmem [shape: bf16[3,16,16], index: 2, kind: input, shape index: {}]   ;;  %s1769_s3 = inlined_call_operand.vmem [shape: f32[16,1], index: 3, kind: input, shape index: {}]   ;;  %s1770_s4 = inlined_call_operand.vmem [shape: f32[16,1], index: 4, kind: input, shape index: {}]   ;;  %s1771_s5 = inlined_call_operand.vmem [shape: f32[16,1], index: 5, kind: input, shape index: {}]   ;;  %s1772_s6 = inlined_call_operand.vmem [shape: bf16[3,16,16], index: 6, kind: input, shape index: {}]   ;;  %s1773_s7 = inlined_call_operand.vmem [shape: f32[16,1], index: 7, kind: input, shape index: {}]   ;;  %s1774_s8 = inlined_call_operand.vmem [shape: f32[16,1], index: 8, kind: input, shape index: {}]   ;;  %s1775_s9 = inlined_call_operand.vmem [shape: f32[16,1], index: 9, kind: input, shape index: {}]   ;;  %s1776_s10 = inlined_call_operand.vmem [shape: bf16[16,32], index: 10, kind: input, shape index: {}]   ;;  %s1777_s11 = inlined_call_operand.vmem [shape: f32[16,1], index: 11, kind: input, shape index: {}]   ;;  %s1778_s12 = inlined_call_operand.vmem [shape: bf16[16,16], index: 12, kind: input, shape index: {}]   ;;  %s1779_s13 = inlined_call_operand.vmem [shape: f32[16,1], index: 13, kind: input, shape index: {}]   ;;  %s1780_s14 = inlined_call_operand.hbm [shape: f32[16,256], index: 14, kind: output, shape index: {}]  }
   0x1   :  { %v1414_v0 = vld [vmem:[%s1766_s0] ss:$8 sps:$4 sm:$0xff]   ;;  %v1244_v1 = vld [vmem:[%s1766_s0 + $0x4] ss:$8 sps:$4 sm:$0xff]   ;;  %201 = vmatprep.mubr.bf16.mxu0 %v1329_v2  ;;  %1236 = vset.pattern.permute.xlu0 %v1329_v2 }
   0x2   :  { %96 = vrot.lane.b32.xlu0 %v1414_v0, %s1327_s15  ;;  %126 = vrot.lane.b32.xlu1 %v1414_v0, %s1328_s18 }
   0x3   :  { %1237 = vset.pattern.permute.xlu1 %v1329_v2 }
   0x6   :  { %98 = vrot.lane.b32.xlu0 %v1244_v1, %s1327_s15  ;;  %128 = vrot.lane.b32.xlu1 %v1244_v1, %s1328_s18 }
   0x7   :  { %19 = vsyncpa [#allocation3], 0  ;;  %v86_v3 = vld [vmem:[%s1769_s3] sm:$0xff]  ;;  %v87_v4 = vld [vmem:[%s1769_s3 + $0x8] sm:$0xff]  ;;  %v51_v5 = vlaneseq  ;;  %vm100_vm6 = vcmask 7168   ;;  %vm130_vm9 = vcmask 1039360  }
   0x8   :  { %v1245_v23 = vld [vmem:[%s1768_s2] sm:$0xff]   ;;  %vm165_vm10 = vcmask 130048   ;;  %v1246_v28 = vld [vmem:[%s1768_s2 + $0x8] sm:$0xff]   ;;  %v1247_v30 = vld [vmem:[%s1768_s2 + $0x10] sm:$0xff]   ;;  %v1330_v32 = vmov 0.0   ;;  %vm1331_vm13 = vmmov 0  }
   0x9   :  { %v1434_v6 = vand.u32 127, %v51_v5  ;;  %v115_v9 = vshrl.u32 %v51_v5, 7  ;;  %v1248_v31 = vld [vmem:[%s1767_s1] sm:$0xff]   ;;  %1203 = vmatprep.subr.bf16.mxu1 %v1330_v32  ;;  %1207 = vmatprep.mubr.msk.bf16.mxu1 %vm1331_vm13, %v1330_v32  ;;  %v1249_v33 = vld [vmem:[%s1767_s1 + $0x8] sm:$0xff]   ;;  %vm559_vm14 = vcmask 261120  }
   0xa   :  { %325 = vperm.xlu0 %1236, %v86_v3   ;;  %330 = vperm.xlu1 %1237, %v87_v4   ;;  %v1250_v34 = vld [vmem:[%s1776_s10] sm:$0xff]  }
   0xb   :  { %v53_v7 = vadd.s32 128, %v1434_v6  ;;  %vm80_vm0 = vcmp.ne.s32.totalorder %v1434_v6, 0  ;;  %v120_v10 = vsub.s32 4, %v115_v9  ;;  %v116_v11 = vsub.s32 0, %v115_v9  ;;  %1204 = vmatpush3.bf16.msra.mxu1 %v1248_v31 }
   0xc   :  { %vm82_vm3 = vcmp.ne.s32.totalorder %v1434_v6, 15  ;;  %1205 = vmatprep.subr.bf16.mxu1 %v1330_v32  ;;  %vm78_vm15 = vcmp.lt.s32.totalorder %v1434_v6, 16  ;;  %v891_v6 = vld [vmem:[%s1774_s8] sm:$0xff] }
   0xd   :  { %v1437_v8 = vand.u32 127, %v53_v7  ;;  %v531_v7 = vld [vmem:[%s1777_s11 + $0x8] sm:$0xff] }
   0xf   :  { %vm81_vm1 = vcmp.ne.s32.totalorder %v1437_v8, 0  ;;  %vm83_vm4 = vcmp.ne.s32.totalorder %v1437_v8, 15  ;;  %1206 = vmatpush3.bf16.msra.mxu1 %v1249_v33  ;;  %v337_v33 = vld [vmem:[%s1770_s4] sm:$0xff] }
  0x10   :  { %vm112_vm2 = vmpackc.low %vm81_vm1, %vm80_vm0  ;;  %vm79_vm0 = vcmp.lt.s32.totalorder %v1437_v8, 16 }
  0x11   :  { %v113_v12 = vsel %vm112_vm2, 65537, %v1329_v2  ;;  %vm141_vm5 = vmpackc.low %vm83_vm4, %vm82_vm3 }
  0x12   :  { %v1444_v13 = vrot.slane %v113_v12, %v120_v10  ;;  %v1446_v14 = vrot.slane %v113_v12, %v116_v11  ;;  %v142_v17 = vsel %vm141_vm5, 65537, %v1329_v2  ;;  %1208 = vmatmul.mubr.msk.bf16.vlgmr.msra.gmra.mrb[0].mxu1 %vm559_vm14, %v1250_v34  ;;  %vm1186_vm14 = vmpackc.low %vm79_vm0, %vm79_vm0 }
  0x13   :  { %v1453_v21 = vrot.slane %v142_v17, %v120_v10  ;;  %v1469_v26 = vrot.slane %v142_v17, %v116_v11  ;;  %757 = vmatprep.mubr.bf16.mxu1 %v1329_v2  ;;  %v530_v11 = vld [vmem:[%s1777_s11] sm:$0xff] }
  0x14   :  { %vm123_vm7 = vcmp.ne.s16.totalorder %v1444_v13, 0  ;;  %vm122_vm8 = vcmp.ne.s16.totalorder %v1446_v14, 0  ;;  %v1252_v14 = vld [vmem:[%s1772_s6 + $0x8] sm:$0xff]  }
  0x15   :  { %vm152_vm11 = vcmp.ne.s16.totalorder %v1453_v21, 0  ;;  %vm151_vm12 = vcmp.ne.s16.totalorder %v1469_v26, 0  ;;  %v1253_v21 = vld [vmem:[%s1772_s6 + $0x10] sm:$0xff]  }
  0x74   :  { %v97_v15 = vpop.permute.xlu0 %96  ;;  %v127_v16 = vpop.permute.xlu1 %126 }
  0x75   :  { %v106_v18 = vsel %vm100_vm6, 0, %v97_v15 }
  0x76   :  { %v124_v22 = vsel %vm122_vm8, %v106_v18, 0 }
  0x78   :  { %v99_v19 = vpop.permute.xlu0 %98  ;;  %v129_v24 = vpop.permute.xlu1 %128 }
  0x79   :  { %v101_v20 = vsel %vm100_vm6, %v97_v15, %v99_v19  ;;  %v135_v25 = vsel %vm130_vm9, %v129_v24, 0  ;;  %v131_v27 = vsel %vm130_vm9, %v127_v16, %v129_v24 }
  0x7a   :  { %1167 = vmatprep.subr.msk.bf16.mxu0 %vm123_vm7, %v101_v20  ;;  %v153_v29 = vsel %vm151_vm12, %v131_v27, 0 }
  0x7b   :  { %170 = vmatpush1.bf16.msra.mxu0 %v124_v22 }
  0x7c   :  { %222 = vmatprep.subr.bf16.mxu0 %v1244_v1 }
  0x7e   :  { %1168 = vmatmul.mubr.msk.bf16.vlgmr.msra.gmra.mrb[0].mxu0 %vm165_vm10, %v1245_v23 }
  0x7f   :  { %223 = vmatpush1.bf16.msra.mxu0 %v1414_v0  ;;  %254 = vmatprep.mubr.bf16.mxu0 %v1329_v2 }
  0x80   :  { %1174 = vmatprep.subr.msk.bf16.mxu0 %vm152_vm11, %v135_v25 }
  0x89   :  { %v326_v35 = vpop.permute.xlu0 %325  ;;  %v331_v37 = vpop.permute.xlu1 %330 }
  0x8a   :  { %1170 = vmatmul.mubr.msk.bf16.vlgmr.msra.gmra.mrb[0].mxu0 %vm165_vm10, %v1246_v28 }
  0x8b   :  { %277 = vmatpush1.bf16.msra.mxu0 %v153_v29  ;;  %308 = vmatprep.mubr.bf16.mxu0 %v1329_v2 }
  0x8c   :  { %959 = vmatprep.subr.bf16.mxu0 %v1244_v1 }
  0x96   :  { %1175 = vmatmul.mubr.msk.bf16.vlgmr.msra.gmra.mrb[0].mxu0 %vm165_vm10, %v1247_v30 }
  0x97   :  { %960 = vmatpush1.bf16.msra.mxu0 %v1414_v0  ;;  %991 = vmatprep.mubr.bf16.mxu0 %v1329_v2 }
  0xe5   :  { %v597_v9 = vpop.f32.mrb[0].mxu1 }
  0xe6   :  { %v1209_v10 = vpop.f32.mrb[1].mxu1 }
  0xe7   :  { %v600_v12 = vpop.f32.mrb[2].mxu1 }
  0xe8   :  { %v1210_v15 = vpop.f32.mrb[3].mxu1 }
 0x169   :  { %v310_v36 = vpop.f32.mrb[0].mxu0 }
 0x16a   :  { %v1498_v38 = vadd.f32 %v326_v35, %v310_v36  ;;  %v312_v39 = vpop.f32.mrb[1].mxu0 }
 0x16b   :  { %v1500_v40 = vadd.f32 %v326_v35, %v312_v39  ;;  %v314_v41 = vpop.f32.mrb[2].mxu0 }
 0x16c   :  { %v1502_v42 = vadd.f32 %v331_v37, %v314_v41  ;;  %v316_v43 = vpop.f32.mrb[3].mxu0  ;;  %v345_v44 = vsel %vm78_vm15, %v1498_v38, 0.0 }
 0x16d   :  { %v1507_v45 = vadd.f32 %v331_v37, %v316_v43  ;;  %v346_v46 = vsel %vm79_vm0, %v1500_v40, 0.0  ;;  %v338_v37 = vld [vmem:[%s1770_s4 + $0x8] sm:$0xff] }
 0x16e   :  { %v349_v47 = vadd.f32 %v346_v46, %v345_v44  ;;  %v347_v48 = vsel %vm78_vm15, %v1502_v42, 0.0  ;;  %v339_v44 = vld [vmem:[%s1771_s5] sm:$0xff] }
 0x16f   :  { %v348_v49 = vsel %vm79_vm0, %v1507_v45, 0.0 }
 0x170   :  { %350 = vadd.xlane.f32.xlu1 %v349_v47  ;;  %v352_v50 = vadd.f32 %v348_v49, %v347_v48  ;;  %v340_v48 = vld [vmem:[%s1771_s5 + $0x8] sm:$0xff] }
 0x172   :  { %353 = vadd.xlane.f32.xlu0 %v352_v50 }
 0x1fd   :  { %v351_v51 = vpop.xlane.xlu1 %350 }
 0x1fe   :  { %v356_v52 = vmul.f32 0.03125, %v351_v51 }
 0x1ff   :  { %v354_v53 = vpop.xlane.xlu0 %353 }
 0x200   :  { %v358_v54 = vsub.f32 %v1498_v38, %v356_v52  ;;  %v359_v55 = vsub.f32 %v1500_v40, %v356_v52  ;;  %v357_v56 = vmul.f32 0.03125, %v354_v53 }
 0x202   :  { %v360_v57 = vsub.f32 %v1502_v42, %v357_v56  ;;  %v361_v58 = vsub.f32 %v1507_v45, %v357_v56  ;;  %v362_v59 = vsel %vm78_vm15, %v358_v54, 0.0  ;;  %v363_v60 = vsel %vm79_vm0, %v359_v55, 0.0 }
 0x203   :  { %v366_v61 = vmul.f32 %v362_v59, %v362_v59  ;;  %v367_v62 = vmul.f32 %v363_v60, %v363_v60 }
 0x204   :  { %v364_v63 = vsel %vm78_vm15, %v360_v57, 0.0  ;;  %v365_v0 = vsel %vm79_vm0, %v361_v58, 0.0 }
 0x205   :  { %v370_v1 = vadd.f32 %v367_v62, %v366_v61  ;;  %v368_v3 = vmul.f32 %v364_v63, %v364_v63  ;;  %v369_v4 = vmul.f32 %v365_v0, %v365_v0 }
 0x207   :  { %371 = vadd.xlane.f32.xlu0 %v370_v1  ;;  %v373_v5 = vadd.f32 %v369_v4, %v368_v3 }
 0x209   :  { %374 = vadd.xlane.f32.xlu1 %v373_v5 }
 0x21a   :  { %539 = vperm.xlu1 %1237, %v531_v7  }
 0x21d   :  { %534 = vperm.xlu0 %1236, %v530_v11  }
 0x294   :  { %v372_v16 = vpop.xlane.xlu0 %371 }
 0x295   :  { %v376_v17 = vmul.f32 0.03125, %v372_v16 }
 0x296   :  { %v375_v18 = vpop.xlane.xlu1 %374 }
 0x297   :  { %v378_v19 = vadd.f32 1e-05, %v376_v17  ;;  %v377_v20 = vmul.f32 0.03125, %v375_v18 }
 0x299   :  { %1255 = vrsqrt.f32 %v378_v19  ;;  %v379_v22 = vadd.f32 1e-05, %v377_v20 }
 0x29a   :  { %v540_v23 = vpop.permute.xlu1 %539 }
 0x29b   :  { %1257 = vrsqrt.f32 %v379_v22  ;;  %v1536_v24 = vadd.f32 %v600_v12, %v540_v23 }
 0x29c   :  { %v535_v25 = vpop.permute.xlu0 %534 }
 0x29d   :  { %v1539_v27 = vmul.f32 0.70710677, %v1536_v24  ;;  %v1541_v28 = vadd.f32 %v597_v9, %v535_v25 }
 0x29f   :  { %v609_v29 = vand.u32 2147483647, %v1539_v27  ;;  %v1545_v30 = vmul.f32 0.70710677, %v1541_v28  ;;  %vm649_vm1 = vcmp.ge.f32.partialorder %v1539_v27, 0.0 }
 0x2a1   :  { %v611_v31 = vmul.f32 0.3275911, %v609_v29  ;;  %v608_v32 = vand.u32 2147483647, %v1545_v30  ;;  %v637_v53 = vsub.f32 0.0, %v609_v29  ;;  %vm648_vm2 = vcmp.ge.f32.partialorder %v1545_v30, 0.0 }
 0x2a3   :  { %v1256_v34 = vpop.eup %1255  ;;  %v613_v35 = vadd.f32 1.0, %v611_v31  ;;  %v610_v36 = vmul.f32 0.3275911, %v608_v32  ;;  %v636_v54 = vsub.f32 0.0, %v608_v32  ;;  %v639_v57 = vmul.f32 %v637_v53, %v609_v29 }
 0x2a4   :  { %v382_v39 = vmul.f32 %v1256_v34, %v337_v33  ;;  %v605_v33 = vmul.f32 0.5, %v1536_v24 }
 0x2a5   :  { %v1258_v41 = vpop.eup %1257  ;;  %1259 = vrcp.f32 %v613_v35  ;;  %v612_v43 = vadd.f32 1.0, %v610_v36  ;;  %v638_v60 = vmul.f32 %v636_v54, %v608_v32 }
 0x2a6   :  { %390 = vperm.xlu1 %1237, %v382_v39   ;;  %v383_v46 = vmul.f32 %v1258_v41, %v338_v37  ;;  %v384_v47 = vmul.f32 %v382_v39, %v356_v52  ;;  %v642_v52 = vmul.f32 1.442695, %v639_v57  ;;  %v604_v39 = vmul.f32 0.5, %v1541_v28 }
 0x2a7   :  { %1261 = vrcp.f32 %v612_v43  ;;  %v640_v1 = vmul.f32 1.442695, %v638_v60 }
 0x2a8   :  { %395 = vperm.xlu0 %1236, %v383_v46   ;;  %v386_v49 = vsub.f32 %v339_v44, %v384_v47  ;;  %v385_v50 = vmul.f32 %v383_v46, %v357_v56  ;;  %1263 = vpow2.f32 %v642_v52  ;;  %v1332_v44 = vmov 1  }
 0x2a9   :  { %1265 = vpow2.f32 %v640_v1 }
 0x2aa   :  { %404 = vperm.xlu1 %1237, %v386_v49   ;;  %v387_v51 = vsub.f32 %v340_v48, %v385_v50 }
 0x2ac   :  { %409 = vperm.xlu0 %1236, %v387_v51  }
 0x2af   :  { %v1260_v55 = vpop.eup %1259 }
 0x2b0   :  { %v619_v58 = vmul.f32 1.0614054, %v1260_v55 }
 0x2b1   :  { %v1262_v59 = vpop.eup %1261 }
 0x2b2   :  { %v621_v61 = vadd.f32 -1.4531521, %v619_v58  ;;  %v618_v62 = vmul.f32 1.0614054, %v1262_v59  ;;  %v1264_v17 = vpop.eup %1263 }
 0x2b3   :  { %v1266_v22 = vpop.eup %1265 }
 0x2b4   :  { %v623_v63 = vmul.f32 %v1260_v55, %v621_v61  ;;  %v620_v0 = vadd.f32 -1.4531521, %v618_v62 }
 0x2b6   :  { %v625_v3 = vadd.f32 1.4214138, %v623_v63  ;;  %v622_v4 = vmul.f32 %v1262_v59, %v620_v0 }
 0x2b8   :  { %v627_v56 = vmul.f32 %v1260_v55, %v625_v3  ;;  %v624_v5 = vadd.f32 1.4214138, %v622_v4 }
 0x2ba   :  { %v629_v7 = vadd.f32 -0.28449672, %v627_v56  ;;  %v626_v9 = vmul.f32 %v1262_v59, %v624_v5 }
 0x2bc   :  { %v631_v10 = vmul.f32 %v1260_v55, %v629_v7  ;;  %v628_v11 = vadd.f32 -0.28449672, %v626_v9 }
 0x2be   :  { %v633_v12 = vadd.f32 0.2548296, %v631_v10  ;;  %v630_v15 = vmul.f32 %v1262_v59, %v628_v11 }
 0x2c0   :  { %v635_v16 = vmul.f32 %v1260_v55, %v633_v12  ;;  %v632_v18 = vadd.f32 0.2548296, %v630_v15 }
 0x2c2   :  { %v645_v19 = vmul.f32 %v1264_v17, %v635_v16  ;;  %v634_v20 = vmul.f32 %v1262_v59, %v632_v18 }
 0x2c4   :  { %v647_v23 = vsub.f32 1.0, %v645_v19  ;;  %v644_v25 = vmul.f32 %v1266_v22, %v634_v20 }
 0x2c6   :  { %v651_v29 = vsub.f32 0.0, %v647_v23  ;;  %v646_v31 = vsub.f32 1.0, %v644_v25 }
 0x2c8   :  { %v653_v32 = vsel %vm649_vm1, %v647_v23, %v651_v29  ;;  %v650_v35 = vsub.f32 0.0, %v646_v31 }
 0x2c9   :  { %v655_v34 = vadd.f32 1.0, %v653_v32 }
 0x2ca   :  { %v652_v37 = vsel %vm648_vm2, %v646_v31, %v650_v35 }
 0x2cb   :  { %v657_v36 = vmul.f32 %v655_v34, %v605_v33  ;;  %v654_v41 = vadd.f32 1.0, %v652_v37 }
 0x2cd   :  { %665 = vperm.xlu0 %1236, %v657_v36   ;;  %v656_v43 = vmul.f32 %v654_v41, %v604_v39 }
 0x2cf   :  { %660 = vperm.xlu1 %1237, %v656_v43  }
 0x2d1   :  { %1239 = vset.pattern.permute.xlu0 %v1332_v44 }
 0x2d2   :  { %675 = vperm.xlu0 %1239, %v657_v36  }
 0x2d3   :  { %1238 = vset.pattern.permute.xlu1 %v1332_v44 }
 0x2d4   :  { %671 = vperm.xlu1 %1238, %v656_v43  }
 0x2d6   :  { %1240 = vset.pattern.permute.xlu0 %v1329_v2 }
 0x2d8   :  { %1241 = vset.pattern.permute.xlu1 %v1329_v2 }
 0x325   :  { %v391_v24 = vpop.permute.xlu1 %390 }
 0x326   :  { %v398_v30 = vmul.f32 %v391_v24, %v1498_v38  ;;  %v399_v46 = vmul.f32 %v391_v24, %v1500_v40 }
 0x327   :  { %v396_v27 = vpop.permute.xlu0 %395 }
 0x328   :  { %v400_v49 = vmul.f32 %v396_v27, %v1502_v42  ;;  %v401_v50 = vmul.f32 %v396_v27, %v1507_v45 }
 0x329   :  { %v405_v28 = vpop.permute.xlu1 %404 }
 0x32a   :  { %v1568_v47 = vadd.f32 %v405_v28, %v398_v30  ;;  %v1570_v48 = vadd.f32 %v405_v28, %v399_v46 }
 0x32b   :  { %v410_v51 = vpop.permute.xlu0 %409 }
 0x32c   :  { %v1575_v53 = vmul.f32 0.70710677, %v1568_v47  ;;  %v1578_v54 = vmul.f32 0.70710677, %v1570_v48  ;;  %v1580_v55 = vadd.f32 %v410_v51, %v400_v49  ;;  %v1582_v38 = vadd.f32 %v410_v51, %v401_v50 }
 0x32e   :  { %v424_v40 = vand.u32 2147483647, %v1575_v53  ;;  %v425_v57 = vand.u32 2147483647, %v1578_v54  ;;  %v1587_v58 = vmul.f32 0.70710677, %v1580_v55 }
 0x32f   :  { %v1590_v42 = vmul.f32 0.70710677, %v1582_v38  ;;  %vm504_vm3 = vcmp.ge.f32.partialorder %v1575_v53, 0.0  ;;  %vm505_vm4 = vcmp.ge.f32.partialorder %v1578_v54, 0.0  ;;  %v417_v53 = vmul.f32 0.5, %v1570_v48 }
 0x330   :  { %v428_v45 = vmul.f32 0.3275911, %v424_v40  ;;  %v429_v59 = vmul.f32 0.3275911, %v425_v57  ;;  %v426_v60 = vand.u32 2147483647, %v1587_v58 }
 0x331   :  { %v427_v61 = vand.u32 2147483647, %v1590_v42  ;;  %v480_v4 = vsub.f32 0.0, %v424_v40  ;;  %v481_v56 = vsub.f32 0.0, %v425_v57  ;;  %vm506_vm5 = vcmp.ge.f32.partialorder %v1587_v58, 0.0 }
 0x332   :  { %v432_v52 = vadd.f32 1.0, %v428_v45  ;;  %v433_v62 = vadd.f32 1.0, %v429_v59  ;;  %v430_v63 = vmul.f32 0.3275911, %v426_v60  ;;  %v482_v9 = vsub.f32 0.0, %v426_v60 }
 0x333   :  { %v431_v0 = vmul.f32 0.3275911, %v427_v61  ;;  %v484_v7 = vmul.f32 %v480_v4, %v424_v40  ;;  %v485_v11 = vmul.f32 %v481_v56, %v425_v57  ;;  %v483_v12 = vsub.f32 0.0, %v427_v61 }
 0x334   :  { %1267 = vrcp.f32 %v432_v52  ;;  %v434_v1 = vadd.f32 1.0, %v430_v63  ;;  %v486_v20 = vmul.f32 %v482_v9, %v426_v60  ;;  %vm507_vm13 = vcmp.ge.f32.partialorder %v1590_v42, 0.0 }
 0x335   :  { %1269 = vrcp.f32 %v433_v62  ;;  %v435_v3 = vadd.f32 1.0, %v431_v0  ;;  %v488_v19 = vmul.f32 1.442695, %v484_v7  ;;  %v490_v25 = vmul.f32 1.442695, %v485_v11 }
 0x336   :  { %1271 = vrcp.f32 %v434_v1  ;;  %v487_v29 = vmul.f32 %v483_v12, %v427_v61  ;;  %v492_v37 = vmul.f32 1.442695, %v486_v20 }
 0x337   :  { %1273 = vrcp.f32 %v435_v3 }
 0x338   :  { %1275 = vpow2.f32 %v488_v19  ;;  %v494_v43 = vmul.f32 1.442695, %v487_v29 }
 0x339   :  { %1277 = vpow2.f32 %v490_v25 }
 0x33a   :  { %1279 = vpow2.f32 %v492_v37 }
 0x33b   :  { %1281 = vpow2.f32 %v494_v43  ;;  %v418_v43 = vmul.f32 0.5, %v1580_v55 }
 0x33e   :  { %v1268_v5 = vpop.eup %1267 }
 0x33f   :  { %v1270_v10 = vpop.eup %1269  ;;  %v444_v15 = vmul.f32 1.0614054, %v1268_v5 }
 0x340   :  { %v445_v16 = vmul.f32 1.0614054, %v1270_v10  ;;  %v1272_v18 = vpop.eup %1271 }
 0x341   :  { %v448_v17 = vadd.f32 -1.4531521, %v444_v15  ;;  %v1274_v23 = vpop.eup %1273  ;;  %v446_v31 = vmul.f32 1.0614054, %v1272_v18 }
 0x342   :  { %v449_v22 = vadd.f32 -1.4531521, %v445_v16  ;;  %v447_v33 = vmul.f32 1.0614054, %v1274_v23  ;;  %v1276_v0 = vpop.eup %1275 }
 0x343   :  { %v452_v32 = vmul.f32 %v1268_v5, %v448_v17  ;;  %v450_v35 = vadd.f32 -1.4531521, %v446_v31  ;;  %v1278_v4 = vpop.eup %1277 }
 0x344   :  { %v453_v34 = vmul.f32 %v1270_v10, %v449_v22  ;;  %v451_v39 = vadd.f32 -1.4531521, %v447_v33  ;;  %v1280_v16 = vpop.eup %1279 }
 0x345   :  { %v456_v36 = vadd.f32 1.4214138, %v452_v32  ;;  %v454_v44 = vmul.f32 %v1272_v18, %v450_v35  ;;  %v1282_v20 = vpop.eup %1281  ;;  %v416_v32 = vmul.f32 0.5, %v1568_v47 }
 0x346   :  { %v457_v41 = vadd.f32 1.4214138, %v453_v34  ;;  %v455_v27 = vmul.f32 %v1274_v23, %v451_v39 }
 0x347   :  { %v460_v24 = vmul.f32 %v1268_v5, %v456_v36  ;;  %v458_v46 = vadd.f32 1.4214138, %v454_v44 }
 0x348   :  { %v461_v30 = vmul.f32 %v1270_v10, %v457_v41  ;;  %v459_v49 = vadd.f32 1.4214138, %v455_v27 }
 0x349   :  { %v464_v28 = vadd.f32 -0.28449672, %v460_v24  ;;  %v462_v51 = vmul.f32 %v1272_v18, %v458_v46  ;;  %v419_v24 = vmul.f32 0.5, %v1582_v38 }
 0x34a   :  { %v465_v50 = vadd.f32 -0.28449672, %v461_v30  ;;  %v463_v57 = vmul.f32 %v1274_v23, %v459_v49 }
 0x34b   :  { %v468_v40 = vmul.f32 %v1268_v5, %v464_v28  ;;  %v466_v59 = vadd.f32 -0.28449672, %v462_v51 }
 0x34c   :  { %v469_v45 = vmul.f32 %v1270_v10, %v465_v50  ;;  %v467_v61 = vadd.f32 -0.28449672, %v463_v57 }
 0x34d   :  { %v472_v60 = vadd.f32 0.2548296, %v468_v40  ;;  %v470_v62 = vmul.f32 %v1272_v18, %v466_v59 }
 0x34e   :  { %v473_v52 = vadd.f32 0.2548296, %v469_v45  ;;  %v471_v1 = vmul.f32 %v1274_v23, %v467_v61  ;;  %v661_v39 = vpop.permute.xlu1 %660 }
 0x34f   :  { %v476_v63 = vmul.f32 %v1268_v5, %v472_v60  ;;  %v474_v56 = vadd.f32 0.2548296, %v470_v62  ;;  %v687_v62 = vld [vmem:[%s1773_s7 + $0x8] sm:$0xff] }
 0x350   :  { %v477_v3 = vmul.f32 %v1270_v10, %v473_v52  ;;  %v475_v9 = vadd.f32 0.2548296, %v471_v1  ;;  %v686_v52 = vld [vmem:[%s1773_s7] sm:$0xff] }
 0x351   :  { %v496_v7 = vmul.f32 %v1276_v0, %v476_v63  ;;  %v478_v12 = vmul.f32 %v1272_v18, %v474_v56  ;;  %v1251_v56 = vld [vmem:[%s1772_s6] sm:$0xff]  }
 0x352   :  { %v497_v11 = vmul.f32 %v1278_v4, %v477_v3  ;;  %v479_v17 = vmul.f32 %v1274_v23, %v475_v9  ;;  %v666_v23 = vpop.permute.xlu0 %665 }
 0x353   :  { %v500_v15 = vsub.f32 1.0, %v496_v7  ;;  %v498_v22 = vmul.f32 %v1280_v16, %v478_v12  ;;  %v672_v51 = vpop.permute.xlu1 %671 }
 0x354   :  { %v501_v19 = vsub.f32 1.0, %v497_v11  ;;  %v499_v29 = vmul.f32 %v1282_v20, %v479_v17 }
 0x355   :  { %v508_v25 = vsub.f32 0.0, %v500_v15  ;;  %v502_v10 = vsub.f32 1.0, %v498_v22 }
 0x356   :  { %v509_v5 = vsub.f32 0.0, %v501_v19  ;;  %v503_v34 = vsub.f32 1.0, %v499_v29  ;;  %v676_v50 = vpop.permute.xlu0 %675 }
 0x357   :  { %v512_v31 = vsel %vm504_vm3, %v500_v15, %v508_v25  ;;  %v510_v35 = vsub.f32 0.0, %v502_v10 }
 0x358   :  { %v516_v33 = vadd.f32 1.0, %v512_v31  ;;  %v513_v18 = vsel %vm505_vm4, %v501_v19, %v509_v5  ;;  %v511_v41 = vsub.f32 0.0, %v503_v34 }
 0x359   :  { %v517_v36 = vadd.f32 1.0, %v513_v18  ;;  %v514_v54 = vsel %vm506_vm5, %v502_v10, %v510_v35  ;;  %v1254_v18 = vld [vmem:[%s1778_s12] sm:$0xff]  }
 0x35a   :  { %v520_v37 = vmul.f32 %v516_v33, %v416_v32  ;;  %v518_v44 = vadd.f32 1.0, %v514_v54  ;;  %v515_v47 = vsel %vm507_vm13, %v503_v34, %v511_v41  ;;  %1199 = vmatmul.mubr.msk.bf16.vlgmr.msra.gmra.mrb[4].mxu0 %vm165_vm10, %v1254_v18 }
 0x35b   :  { %v519_v27 = vadd.f32 1.0, %v515_v47  ;;  %v521_v30 = vmul.f32 %v517_v36, %v417_v53 }
 0x35c   :  { %v522_v46 = vmul.f32 %v518_v44, %v418_v43  ;;  %v668_v28 = vadd.f32 %v661_v39, %v520_v37 }
 0x35d   :  { %v523_v58 = vmul.f32 %v519_v27, %v419_v24  ;;  %v678_v57 = vadd.f32 %v672_v51, %v521_v30 }
 0x35e   :  { %v669_v49 = vadd.f32 %v666_v23, %v522_v46  ;;  %v680_v55 = vsel %vm78_vm15, %v668_v28, 0.0 }
 0x35f   :  { %v679_v40 = vadd.f32 %v676_v50, %v523_v58  ;;  %v681_v60 = vsel %vm79_vm0, %v678_v57, 0.0 }
 0x360   :  { %v682_v48 = vsel %vm78_vm15, %v669_v49, 0.0  ;;  %v1190_v42 = vpack.c.bf16 %v669_v49, %v668_v28 }
 0x361   :  { %v684_v45 = vpack.c.bf16 %v682_v48, %v680_v55  ;;  %v1187_v59 = vpack.c.bf16 %v679_v40, %v678_v57  ;;  %v683_v38 = vsel %vm79_vm0, %v679_v40, 0.0 }
 0x362   :  { %v685_v61 = vpack.c.bf16 %v683_v38, %v681_v60 }
 0x363   :  { %701 = vrot.lane.b32.xlu0 %v684_v45, %s1328_s18  ;;  %690 = vrot.lane.b32.xlu1 %v684_v45, %s1327_s15 }
 0x367   :  { %692 = vrot.lane.b32.xlu1 %v685_v61, %s1327_s15  ;;  %879 = vperm.xlu0 %1240, %v686_v52   ;;  %v894_v52 = vld [vmem:[%s1775_s9 + $0x8] sm:$0xff] }
 0x36b   :  { %703 = vrot.lane.b32.xlu1 %v685_v61, %s1328_s18  ;;  %v893_v61 = vld [vmem:[%s1775_s9] sm:$0xff]  ;;  %s1333_s9 = smov [#allocation2]  }
 0x36f   :  { %884 = vperm.xlu1 %1241, %v687_v62  }
 0x3d5   :  { %v691_v63 = vpop.permute.xlu1 %690  ;;  %v702_v13 = vpop.permute.xlu0 %701 }
 0x3d6   :  { %v697_v0 = vsel %vm100_vm6, 0, %v691_v63 }
 0x3d7   :  { %v699_v4 = vsel %vm122_vm8, %v697_v0, 0 }
 0x3d9   :  { %v693_v1 = vpop.permute.xlu1 %692 }
 0x3da   :  { %v694_v3 = vsel %vm100_vm6, %v691_v63, %v693_v1  ;;  %vm1189_vm6 = vmpackc.low %vm78_vm15, %vm78_vm15  ;;  %v939_v1 = vld [vmem:[%s1779_s13] sm:$0xff] }
 0x3db   :  { %1183 = vmatprep.subr.msk.bf16.mxu1 %vm123_vm7, %v694_v3  ;;  %v940_v3 = vld [vmem:[%s1779_s13 + $0x8] sm:$0xff]  ;;  %s1151_s13 = sshll.u32 %s1333_s9, 4  ;;  %s1152_s13 = int_to_ptr.vmem [resolvable:$true] %s1151_s13 }
 0x3dc   :  { %726 = vmatpush1.bf16.msra.mxu1 %v699_v4  ;;  %s1303_s3 = scalar_lea.vmem %s1152_s13, 512  ;;  %p1308_p1 = scmp.lt.s32.totalorder %s1152_s13, %s1152_s13 }
 0x3dd   :  { %1188 = vmatprep.subr.msk.bf16.mxu1 %vm1186_vm14, %v1187_v59  ;;  %v704_v7 = vpop.permute.xlu1 %703  ;;  %p1304_p0 = scmp.ne.s32.totalorder %s1152_s13, %s1303_s3  ;;  %p1309_p2 = scmp.lt.s32.totalorder %s1303_s3, %s1303_s3 }
 0x3de   :  { %v708_v9 = vsel %vm130_vm9, %v704_v7, 0  ;;  %v705_v11 = vsel %vm130_vm9, %v702_v13, %v704_v7 }
 0x3df   :  { %1184 = vmatmul.mubr.msk.bf16.vlgmr.msra.gmra.mrb[4].mxu1 %vm165_vm10, %v1251_v56  ;;  %v710_v12 = vsel %vm151_vm12, %v705_v11, 0  ;;  %p1310_p3 = por %p1309_p2, %p1308_p1 }
 0x3e0   :  { %1191 = vmatpush1.bf16.msk.msra.mxu1 %vm1189_vm6, %v1190_v42  ;;  %808 = vmatprep.mubr.bf16.mxu1 %v1329_v2  ;;  %v892_v42 = vld [vmem:[%s1774_s8 + $0x8] sm:$0xff] }
 0x3e1   :  { %1196 = vmatprep.subr.msk.bf16.mxu1 %vm152_vm11, %v708_v9  ;;  %p1311_p4 = pnand %p1310_p3, %p1304_p0 }
 0x3e6   :  { %v880_v15 = vpop.permute.xlu0 %879 }
 0x3eb   :  { %1192 = vmatmul.mubr.msk.bf16.vlgmr.msra.gmra.mrb[4].mxu1 %vm165_vm10, %v1252_v14 }
 0x3ec   :  { %831 = vmatpush1.bf16.msra.mxu1 %v710_v12  ;;  %862 = vmatprep.mubr.bf16.mxu1 %v1329_v2 }
 0x3ee   :  { %v885_v17 = vpop.permute.xlu1 %884 }
 0x3f7   :  { %1197 = vmatmul.mubr.msk.bf16.vlgmr.msra.gmra.mrb[4].mxu1 %vm165_vm10, %v1253_v21 }
 0x42d   :  { %v1706_v4 = vpop.f32.mrb[4].mxu0 }
 0x42e   :  { %v1708_v56 = vpop.f32.mrb[5].mxu0 }
 0x42f   :  { %v1710_v7 = vpop.f32.mrb[6].mxu0 }
 0x430   :  { %v1712_v9 = vpop.f32.mrb[7].mxu0 }
 0x4ca   :  { %v864_v16 = vpop.f32.mrb[4].mxu1 }
 0x4cb   :  { %v1652_v19 = vadd.f32 %v880_v15, %v864_v16  ;;  %v866_v20 = vpop.f32.mrb[5].mxu1 }
 0x4cc   :  { %v1654_v22 = vadd.f32 %v880_v15, %v866_v20  ;;  %v868_v26 = vpop.f32.mrb[6].mxu1 }
 0x4cd   :  { %v1656_v25 = vadd.f32 %v885_v17, %v868_v26  ;;  %v870_v29 = vpop.f32.mrb[7].mxu1  ;;  %v895_v2 = vsel %vm78_vm15, %v1652_v19, 0.0 }
 0x4ce   :  { %v1661_v5 = vadd.f32 %v885_v17, %v870_v29  ;;  %v896_v10 = vsel %vm79_vm0, %v1654_v22, 0.0 }
 0x4cf   :  { %v899_v31 = vadd.f32 %v896_v10, %v895_v2  ;;  %v897_v32 = vsel %vm78_vm15, %v1656_v25, 0.0 }
 0x4d0   :  { %v898_v33 = vsel %vm79_vm0, %v1661_v5, 0.0 }
 0x4d1   :  { %900 = vadd.xlane.f32.xlu1 %v899_v31  ;;  %v902_v34 = vadd.f32 %v898_v33, %v897_v32 }
 0x4d3   :  { %903 = vadd.xlane.f32.xlu0 %v902_v34 }
 0x55e   :  { %v901_v35 = vpop.xlane.xlu1 %900 }
 0x55f   :  { %v905_v36 = vmul.f32 0.03125, %v901_v35 }
 0x560   :  { %v904_v23 = vpop.xlane.xlu0 %903 }
 0x561   :  { %v907_v37 = vsub.f32 %v1652_v19, %v905_v36  ;;  %v908_v39 = vsub.f32 %v1654_v22, %v905_v36  ;;  %v906_v41 = vmul.f32 0.03125, %v904_v23 }
 0x563   :  { %v909_v53 = vsub.f32 %v1656_v25, %v906_v41  ;;  %v910_v54 = vsub.f32 %v1661_v5, %v906_v41  ;;  %v911_v43 = vsel %vm78_vm15, %v907_v37, 0.0  ;;  %v912_v44 = vsel %vm79_vm0, %v908_v39, 0.0 }
 0x564   :  { %v915_v47 = vmul.f32 %v911_v43, %v911_v43  ;;  %v916_v24 = vmul.f32 %v912_v44, %v912_v44 }
 0x565   :  { %v913_v27 = vsel %vm78_vm15, %v909_v53, 0.0  ;;  %v914_v30 = vsel %vm79_vm0, %v910_v54, 0.0 }
 0x566   :  { %v919_v46 = vadd.f32 %v916_v24, %v915_v47  ;;  %v917_v28 = vmul.f32 %v913_v27, %v913_v27  ;;  %v918_v58 = vmul.f32 %v914_v30, %v914_v30 }
 0x568   :  { %920 = vadd.xlane.f32.xlu0 %v919_v46  ;;  %v922_v49 = vadd.f32 %v918_v58, %v917_v28 }
 0x56a   :  { %923 = vadd.xlane.f32.xlu1 %v922_v49 }
 0x5f5   :  { %v921_v50 = vpop.xlane.xlu0 %920 }
 0x5f6   :  { %v925_v51 = vmul.f32 0.03125, %v921_v50 }
 0x5f7   :  { %v924_v40 = vpop.xlane.xlu1 %923 }
 0x5f8   :  { %v927_v57 = vadd.f32 1e-05, %v925_v51  ;;  %v926_v48 = vmul.f32 0.03125, %v924_v40 }
 0x5fa   :  { %1283 = vrsqrt.f32 %v927_v57  ;;  %v928_v55 = vadd.f32 1e-05, %v926_v48 }
 0x5fc   :  { %1285 = vrsqrt.f32 %v928_v55 }
 0x604   :  { %v1284_v8 = vpop.eup %1283 }
 0x605   :  { %v931_v45 = vmul.f32 %v1284_v8, %v891_v6 }
 0x606   :  { %v1286_v59 = vpop.eup %1285 }
 0x607   :  { %1004 = vperm.xlu0 %1240, %v931_v45   ;;  %v932_v38 = vmul.f32 %v1286_v59, %v892_v42  ;;  %v933_v60 = vmul.f32 %v931_v45, %v905_v36 }
 0x609   :  { %1009 = vperm.xlu1 %1241, %v932_v38   ;;  %v934_v62 = vmul.f32 %v932_v38, %v906_v41  ;;  %v935_v63 = vsub.f32 %v893_v61, %v933_v60 }
 0x60b   :  { %v936_v0 = vsub.f32 %v894_v52, %v934_v62 }
 0x60d   :  { %1018 = vperm.xlu1 %1241, %v935_v63   ;;  %1023 = vperm.xlu0 %1240, %v936_v0  }
 0x611   :  { %943 = vperm.xlu1 %1241, %v939_v1   ;;  %948 = vperm.xlu0 %1240, %v940_v3  }
 0x686   :  { %v1005_v13 = vpop.permute.xlu0 %1004 }
 0x687   :  { %v1012_v11 = vmul.f32 %v1005_v13, %v1652_v19  ;;  %v1013_v12 = vmul.f32 %v1005_v13, %v1654_v22 }
 0x688   :  { %v1010_v14 = vpop.permute.xlu1 %1009 }
 0x689   :  { %v1014_v21 = vmul.f32 %v1010_v14, %v1656_v25  ;;  %v1015_v15 = vmul.f32 %v1010_v14, %v1661_v5 }
 0x68c   :  { %v1019_v16 = vpop.permute.xlu1 %1018  ;;  %v1024_v17 = vpop.permute.xlu0 %1023 }
 0x68d   :  { %v1718_v20 = vadd.f32 %v1019_v16, %v1012_v11  ;;  %v1720_v26 = vadd.f32 %v1019_v16, %v1013_v12  ;;  %v1722_v29 = vadd.f32 %v1024_v17, %v1014_v21  ;;  %v1724_v2 = vadd.f32 %v1024_v17, %v1015_v15 }
 0x68f   :  { %v1727_v10 = vmul.f32 0.70710677, %v1718_v20  ;;  %v1730_v19 = vmul.f32 0.70710677, %v1720_v26  ;;  %v1733_v22 = vmul.f32 0.70710677, %v1722_v29 }
 0x690   :  { %v1736_v25 = vmul.f32 0.70710677, %v1724_v2 }
 0x691   :  { %v1038_v5 = vand.u32 2147483647, %v1727_v10  ;;  %v1039_v31 = vand.u32 2147483647, %v1730_v19  ;;  %v1040_v32 = vand.u32 2147483647, %v1733_v22 }
 0x692   :  { %v1041_v33 = vand.u32 2147483647, %v1736_v25  ;;  %vm1118_vm7 = vcmp.ge.f32.partialorder %v1727_v10, 0.0  ;;  %vm1119_vm8 = vcmp.ge.f32.partialorder %v1730_v19, 0.0  ;;  %vm1120_vm9 = vcmp.ge.f32.partialorder %v1733_v22, 0.0 }
 0x693   :  { %v1042_v34 = vmul.f32 0.3275911, %v1038_v5  ;;  %v1043_v18 = vmul.f32 0.3275911, %v1039_v31  ;;  %v1044_v35 = vmul.f32 0.3275911, %v1040_v32 }
 0x694   :  { %v1045_v36 = vmul.f32 0.3275911, %v1041_v33  ;;  %v1094_v53 = vsub.f32 0.0, %v1038_v5  ;;  %v1095_v54 = vsub.f32 0.0, %v1039_v31  ;;  %v1096_v47 = vsub.f32 0.0, %v1040_v32 }
 0x695   :  { %v1046_v23 = vadd.f32 1.0, %v1042_v34  ;;  %v1047_v37 = vadd.f32 1.0, %v1043_v18  ;;  %v1048_v39 = vadd.f32 1.0, %v1044_v35  ;;  %v1097_v30 = vsub.f32 0.0, %v1041_v33 }
 0x696   :  { %v1049_v41 = vadd.f32 1.0, %v1045_v36  ;;  %v1098_v44 = vmul.f32 %v1094_v53, %v1038_v5  ;;  %v1099_v27 = vmul.f32 %v1095_v54, %v1039_v31  ;;  %v1100_v51 = vmul.f32 %v1096_v47, %v1040_v32 }
 0x697   :  { %1287 = vrcp.f32 %v1046_v23  ;;  %v1101_v55 = vmul.f32 %v1097_v30, %v1041_v33  ;;  %vm1121_vm10 = vcmp.ge.f32.partialorder %v1736_v25, 0.0 }
 0x698   :  { %1289 = vrcp.f32 %v1047_v37  ;;  %v1102_v50 = vmul.f32 1.442695, %v1098_v44  ;;  %v1104_v48 = vmul.f32 1.442695, %v1099_v27  ;;  %v1106_v60 = vmul.f32 1.442695, %v1100_v51 }
 0x699   :  { %1291 = vrcp.f32 %v1048_v39  ;;  %v1108_v62 = vmul.f32 1.442695, %v1101_v55  ;;  %v1030_v55 = vmul.f32 0.5, %v1718_v20  ;;  %v949_v20 = vpop.permute.xlu0 %948 }
 0x69a   :  { %1293 = vrcp.f32 %v1049_v41 }
 0x69b   :  { %1295 = vpow2.f32 %v1102_v50 }
 0x69c   :  { %1297 = vpow2.f32 %v1104_v48 }
 0x69d   :  { %1299 = vpow2.f32 %v1106_v60 }
 0x69e   :  { %1301 = vpow2.f32 %v1108_v62 }
 0x6a1   :  { %v1288_v43 = vpop.eup %1287 }
 0x6a2   :  { %v1290_v24 = vpop.eup %1289  ;;  %v1058_v46 = vmul.f32 1.0614054, %v1288_v43 }
 0x6a3   :  { %v1059_v28 = vmul.f32 1.0614054, %v1290_v24  ;;  %v1292_v49 = vpop.eup %1291 }
 0x6a4   :  { %v1062_v58 = vadd.f32 -1.4531521, %v1058_v46  ;;  %v1294_v57 = vpop.eup %1293  ;;  %v1060_v8 = vmul.f32 1.0614054, %v1292_v49 }
 0x6a5   :  { %v1063_v40 = vadd.f32 -1.4531521, %v1059_v28  ;;  %v1061_v45 = vmul.f32 1.0614054, %v1294_v57  ;;  %v1296_v35 = vpop.eup %1295 }
 0x6a6   :  { %v1066_v6 = vmul.f32 %v1288_v43, %v1062_v58  ;;  %v1064_v38 = vadd.f32 -1.4531521, %v1060_v8  ;;  %v1298_v37 = vpop.eup %1297 }
 0x6a7   :  { %v1067_v42 = vmul.f32 %v1290_v24, %v1063_v40  ;;  %v1065_v52 = vadd.f32 -1.4531521, %v1061_v45  ;;  %v1300_v27 = vpop.eup %1299  ;;  %v944_v40 = vpop.permute.xlu1 %943 }
 0x6a8   :  { %v1070_v59 = vadd.f32 1.4214138, %v1066_v6  ;;  %v1068_v0 = vmul.f32 %v1292_v49, %v1064_v38  ;;  %v1302_v28 = vpop.eup %1301  ;;  %v994_v10 = vadd.f32 %v1706_v4, %v944_v40  ;;  %v996_v60 = vadd.f32 %v1708_v56, %v944_v40 }
 0x6a9   :  { %v1071_v61 = vadd.f32 1.4214138, %v1067_v42  ;;  %v1069_v3 = vmul.f32 %v1294_v57, %v1065_v52  ;;  %v1031_v42 = vmul.f32 0.5, %v1720_v26  ;;  %v1032_v52 = vmul.f32 0.5, %v1722_v29 }
 0x6aa   :  { %v1074_v63 = vmul.f32 %v1288_v43, %v1070_v59  ;;  %v1072_v14 = vadd.f32 1.4214138, %v1068_v0  ;;  %v1033_v0 = vmul.f32 0.5, %v1724_v2  ;;  %v998_v4 = vadd.f32 %v1710_v7, %v949_v20 }
 0x6ab   :  { %v1075_v1 = vmul.f32 %v1290_v24, %v1071_v61  ;;  %v1073_v12 = vadd.f32 1.4214138, %v1069_v3  ;;  %v1000_v56 = vadd.f32 %v1712_v9, %v949_v20 }
 0x6ac   :  { %v1078_v13 = vadd.f32 -0.28449672, %v1074_v63  ;;  %v1076_v15 = vmul.f32 %v1292_v49, %v1072_v14 }
 0x6ad   :  { %v1079_v11 = vadd.f32 -0.28449672, %v1075_v1  ;;  %v1077_v17 = vmul.f32 %v1294_v57, %v1073_v12 }
 0x6ae   :  { %v1082_v21 = vmul.f32 %v1288_v43, %v1078_v13  ;;  %v1080_v31 = vadd.f32 -0.28449672, %v1076_v15 }
 0x6af   :  { %v1083_v16 = vmul.f32 %v1290_v24, %v1079_v11  ;;  %v1081_v33 = vadd.f32 -0.28449672, %v1077_v17 }
 0x6b0   :  { %v1086_v5 = vadd.f32 0.2548296, %v1082_v21  ;;  %v1084_v18 = vmul.f32 %v1292_v49, %v1080_v31 }
 0x6b1   :  { %v1087_v32 = vadd.f32 0.2548296, %v1083_v16  ;;  %v1085_v23 = vmul.f32 %v1294_v57, %v1081_v33 }
 0x6b2   :  { %v1090_v34 = vmul.f32 %v1288_v43, %v1086_v5  ;;  %v1088_v41 = vadd.f32 0.2548296, %v1084_v18 }
 0x6b3   :  { %v1091_v36 = vmul.f32 %v1290_v24, %v1087_v32  ;;  %v1089_v54 = vadd.f32 0.2548296, %v1085_v23 }
 0x6b4   :  { %v1110_v39 = vmul.f32 %v1296_v35, %v1090_v34  ;;  %v1092_v47 = vmul.f32 %v1292_v49, %v1088_v41 }
 0x6b5   :  { %v1111_v53 = vmul.f32 %v1298_v37, %v1091_v36  ;;  %v1093_v46 = vmul.f32 %v1294_v57, %v1089_v54 }
 0x6b6   :  { %v1114_v44 = vsub.f32 1.0, %v1110_v39  ;;  %v1112_v50 = vmul.f32 %v1300_v27, %v1092_v47 }
 0x6b7   :  { %v1115_v30 = vsub.f32 1.0, %v1111_v53  ;;  %v1113_v51 = vmul.f32 %v1302_v28, %v1093_v46 }
 0x6b8   :  { %v1122_v58 = vsub.f32 0.0, %v1114_v44  ;;  %v1116_v48 = vsub.f32 1.0, %v1112_v50 }
 0x6b9   :  { %v1123_v43 = vsub.f32 0.0, %v1115_v30  ;;  %v1117_v49 = vsub.f32 1.0, %v1113_v51 }
 0x6ba   :  { %v1126_v24 = vsel %vm1118_vm7, %v1114_v44, %v1122_v58  ;;  %v1124_v45 = vsub.f32 0.0, %v1116_v48 }
 0x6bb   :  { %v1127_v6 = vsel %vm1119_vm8, %v1115_v30, %v1123_v43  ;;  %v1130_v8 = vadd.f32 1.0, %v1126_v24  ;;  %v1125_v38 = vsub.f32 0.0, %v1117_v49 }
 0x6bc   :  { %v1131_v57 = vadd.f32 1.0, %v1127_v6  ;;  %v1128_v61 = vsel %vm1120_vm9, %v1116_v48, %v1124_v45 }
 0x6bd   :  { %v1134_v59 = vmul.f32 %v1130_v8, %v1030_v55  ;;  %v1129_v63 = vsel %vm1121_vm10, %v1117_v49, %v1125_v38  ;;  %v1132_v26 = vadd.f32 1.0, %v1128_v61 }
 0x6be   :  { %v1135_v19 = vmul.f32 %v1131_v57, %v1031_v42  ;;  %v1133_v22 = vadd.f32 1.0, %v1129_v63 }
 0x6bf   :  { %v1138_v62 = vadd.f32 %v1134_v59, %v994_v10  ;;  %v1136_v3 = vmul.f32 %v1132_v26, %v1032_v52 }
 0x6c0   :  { %v1139_v1 = vadd.f32 %v1135_v19, %v996_v60  ;;  %v1137_v25 = vmul.f32 %v1133_v22, %v1033_v0 }
 0x6c1   :  { %1142 = vst [vmem:[#allocation2] sm:$0xff] %v1138_v62  ;;  %v1140_v13 = vadd.f32 %v1136_v3, %v998_v4 }
 0x6c2   :  { %1143 = vst [vmem:[#allocation2 + $0x8] sm:$0xff] %v1139_v1  ;;  %v1141_v14 = vadd.f32 %v1137_v25, %v1000_v56 }
 0x6c3   :  { %1144 = vst [vmem:[#allocation2 + $0x10] sm:$0xff] %v1140_v13 }
 0x6c4   :  { %1145 = vst [vmem:[#allocation2 + $0x18] sm:$0xff] %v1141_v14 }
 0x6c5   :  { %1314 = shalt.err (!%p1311_p4)
}
 0x6c6   :  { %s1315_s24 = scalar_lea.hbm %s1780_s14, 512 }
 0x6c7   :  { %p1316_p5 = scmp.ne.s32.totalorder %s1780_s14, %s1315_s24  ;;  %p1319_p6 = scmp.lt.u32.totalorder %s1315_s24, %s1780_s14 }
 0x6c9   :  { %p1321_p7 = pnand %p1319_p6, %p1316_p5 }
 0x6cb   :  { %1324 = shalt.err (!%p1321_p7)
}
 0x6cc   :  { %s1334_s15 = smov 256   ;;  %s1335_s7 = smov 16  }
 0x6cd   :  { %1157 = dma.vmem_to_hbm [thread:$0]  %s1152_s13, 512, %s1780_s14, [#allocation3], %s1334_s15, %s1334_s15, %s1335_s7  }
 0x6ce   :  { %1325 = dma.done.wait [#allocation3], 512  }
 0x6cf   :  { %1326 = vsyncadd [#allocation3], 4294966784 }
 0x6d0   :  { %1161 = vsyncpa [#allocation3], 1 }

</bundles_post_ra>
